<compile_context>
chip_gen: v5e
topology: v5e:2x2
jax: 0.10.0
libtpu: 0.0.40
codegen_flags: <defaults>
</compile_context>

<pallas_src>
import functools

import jax
import jax.numpy as jnp
from jax import lax
from jax.experimental import pallas as pl
from jax.experimental.pallas import tpu as pltpu


def _attn_decoder_kernel(e_ref, whh_ref, bias_ref, wout_ref, bout_ref, std_ref,
                         h0_ref, c0_ref,
                         tok_out_ref, h_out_ref,
                         h_sc, c_sc, tok_sc, active_sc,
                         *, max_length, sos_token, eos_token, unroll):
    batch, hidden = h0_ref.shape
    vocab = e_ref.shape[0]

    # ---- prologue: zero outputs, init state, hoist loop invariants ----
    tok_out_ref[...] = jnp.zeros_like(tok_out_ref)        # output_all = zeros(...)
    h_sc[...] = h0_ref[...]
    c_sc[...] = c0_ref[...]
    tok_sc[...] = jnp.full((batch, 1), sos_token, dtype=jnp.int32)
    active_sc[0] = jnp.int32(1)

    col_v = lax.broadcasted_iota(jnp.int32, (batch, vocab), 1)        # vocab lane ids
    step_cols = lax.broadcasted_iota(jnp.int32, (batch, max_length), 1)

    e_f = e_ref[...]          # [V, 4H]  = emb @ W_ih fused   (gate order i|f|o|g)
    w_hh = whh_ref[...]       # [H, 4H]
    bias = bias_ref[...]      # [1, 4H]  = b_ih + b_hh fused
    w_out = wout_ref[...]     # [H, V]
    b_out = bout_ref[...]     # [1, V]

    def step(idt):
        @pl.when(active_sc[0] == 1)
        def _():
            h = h_sc[...]
            c = c_sc[...]

            # x = embedding(tokens) folded into the gate matmul via one-hot @ E'
            onehot = (tok_sc[...] == col_v).astype(jnp.float32)       # [B, V]

            # Single fused, lane-dense [B, 4H] gate pre-activation (2 MXU pushes).
            pre = (jnp.dot(onehot, e_f, preferred_element_type=jnp.float32)
                   + jnp.dot(h, w_hh, preferred_element_type=jnp.float32)
                   + bias)                                            # [B, 4H]

            sg = jax.nn.sigmoid(pre[:, :3 * hidden])                  # i | f | o
            cellgate = jnp.tanh(pre[:, 3 * hidden:])                  # g
            ingate = sg[:, :hidden]
            forgetgate = sg[:, hidden:2 * hidden]
            outgate = sg[:, 2 * hidden:]

            c_new = forgetgate * c + ingate * cellgate
            h_new = outgate * jnp.tanh(c_new)

            logits = (jnp.dot(h_new, w_out, preferred_element_type=jnp.float32)
                      + b_out + std_ref[idt])                         # [B, V]

            # argmax over vocab (first maximal index), kept 2-D as [B, 1]
            maxv = jnp.max(logits, axis=1, keepdims=True)
            idx = jnp.min(jnp.where(logits == maxv, col_v, vocab),
                          axis=1, keepdims=True)

            # Lane-dense token writeback: update column idt of the [B, L] slab.
            tok_out_ref[...] = jnp.where(step_cols == idt, idx, tok_out_ref[...])

            h_sc[...] = h_new
            c_sc[...] = c_new
            tok_sc[...] = idx
            # while cond: max(tokens) > EOS   (id < max_length via loop bound)
            active_sc[0] = (jnp.max(idx) > eos_token).astype(jnp.int32)

    if unroll:
        # Trace-time unroll: constant step indices -> static std loads, constant
        # token-column masks, full LLO scheduling visibility across steps.
        for idt in range(max_length):
            step(idt)
    else:
        pl.loop(0, max_length)(step)

    h_out_ref[...] = h_sc[...]


def attn_decoder_forward(params, encoder_output, std, h, c, *,
                         max_length, sos_token=1, eos_token=0):
    batch = encoder_output.shape[1]
    vocab, hidden = params["emb"].shape
    h = jnp.reshape(h, (batch, hidden)).astype(jnp.float32)
    c = jnp.reshape(c, (batch, hidden)).astype(jnp.float32)

    # ---- one-time weight fusion (outside the kernel) ----
    # gate order i | f | o | g so sigmoid applies to a contiguous [*, 3H] slab.
    order = (0, 1, 3, 2)
    w_ih_f = jnp.concatenate([params["w_ih"][g] for g in order], axis=1)   # [H, 4H]
    w_hh_f = jnp.concatenate([params["w_hh"][g] for g in order], axis=1)   # [H, 4H]
    bias_f = jnp.concatenate(
        [params["b_ih"][g] + params["b_hh"][g] for g in order])[None, :]   # [1, 4H]
    # Fold the embedding lookup into the input-gate matmul: E' = emb @ W_ih'.
    e_fused = jnp.dot(params["emb"], w_ih_f,
                      precision=jax.lax.Precision.HIGHEST)                 # [V, 4H]

    kernel = functools.partial(_attn_decoder_kernel, max_length=max_length,
                               sos_token=sos_token, eos_token=eos_token,
                               unroll=max_length <= 16)
    vmem = pl.BlockSpec(memory_space=pltpu.MemorySpace.VMEM)

    flops = max_length * (2 * batch * vocab * 4 * hidden
                          + 2 * batch * hidden * 4 * hidden
                          + 2 * batch * hidden * vocab)
    transcendentals = max_length * batch * 5 * hidden
    bytes_accessed = 4 * (vocab * 4 * hidden + hidden * 4 * hidden + 4 * hidden
                          + hidden * vocab + vocab
                          + max_length * batch * vocab
                          + 3 * batch * hidden
                          + max_length * batch)

    tok_out, h_out = pl.pallas_call(
        kernel,
        out_shape=(jax.ShapeDtypeStruct((batch, max_length), jnp.int32),
                   jax.ShapeDtypeStruct((batch, hidden), jnp.float32)),
        in_specs=[vmem] * 8,
        out_specs=(vmem, vmem),
        scratch_shapes=[
            pltpu.VMEM((batch, hidden), jnp.float32),   # h state
            pltpu.VMEM((batch, hidden), jnp.float32),   # c state
            pltpu.VMEM((batch, 1), jnp.int32),          # current tokens
            pltpu.SMEM((1,), jnp.int32),                # active flag (early stop)
        ],
        compiler_params=pltpu.CompilerParams(vmem_limit_bytes=32 * 1024 * 1024),
        cost_estimate=pl.CostEstimate(flops=flops,
                                      transcendentals=transcendentals,
                                      bytes_accessed=bytes_accessed),
    )(e_fused, w_hh_f, bias_f, params["w_out"], params["b_out"], std, h, c)

    # Return [max_length, batch] to match the torch output_all convention.
    return tok_out.T, h_out


if __name__ == "__main__":
    HIDDEN, VOCAB, BATCH, MAXLEN = 32, 16, 8, 8   # BATCH=8 fills f32 sublanes

    key = jax.random.PRNGKey(0)
    ks = jax.random.split(key, 12)

    xav = (6.0 / (HIDDEN + HIDDEN)) ** 0.5  # xavier_uniform bound for [*, H, H]
    params = {
        "emb":   jax.random.normal(ks[0], (VOCAB, HIDDEN), jnp.float32),
        "w_ih":  jax.random.uniform(ks[1], (4, HIDDEN, HIDDEN), jnp.float32, -xav, xav),
        "w_hh":  jax.random.uniform(ks[2], (4, HIDDEN, HIDDEN), jnp.float32, -xav, xav),
        "b_ih":  jax.random.normal(ks[3], (4, HIDDEN), jnp.float32),
        "b_hh":  jax.random.normal(ks[4], (4, HIDDEN), jnp.float32),
        "w_out": jax.random.normal(ks[5], (HIDDEN, VOCAB), jnp.float32) * (1.0 / HIDDEN ** 0.5),
        "b_out": jax.random.normal(ks[6], (1, VOCAB), jnp.float32) * (1.0 / HIDDEN ** 0.5),
    }

    encoder_output = jax.random.normal(ks[7], (MAXLEN, BATCH, HIDDEN), jnp.float32)
    std = jax.random.normal(ks[8], (MAXLEN, BATCH, VOCAB), jnp.float32)
    h0 = jax.random.normal(ks[9], (1, BATCH, HIDDEN), jnp.float32)
    c0 = jax.random.normal(ks[10], (BATCH, HIDDEN), jnp.float32)

    output_all, h_final = attn_decoder_forward(
        params, encoder_output, std, h0, c0, max_length=MAXLEN)
    jax.block_until_ready((output_all, h_final))

    assert output_all.shape == (MAXLEN, BATCH) and output_all.dtype == jnp.int32
    assert h_final.shape == (BATCH, HIDDEN)
    print("KERNEL_OK")
</pallas_src>

<mosaic_0001>
module attributes {stable_mosaic.version = 11 : i64} {
  func.func @_attn_decoder_kernel(%arg0: memref<16x128xf32, #tpu.memory_space<vmem>>, %arg1: memref<32x128xf32, #tpu.memory_space<vmem>>, %arg2: memref<1x128xf32, #tpu.memory_space<vmem>>, %arg3: memref<32x16xf32, #tpu.memory_space<vmem>>, %arg4: memref<1x16xf32, #tpu.memory_space<vmem>>, %arg5: memref<8x8x16xf32, #tpu.memory_space<vmem>>, %arg6: memref<8x32xf32, #tpu.memory_space<vmem>>, %arg7: memref<8x32xf32, #tpu.memory_space<vmem>>, %arg8: memref<8x8xi32, #tpu.memory_space<vmem>>, %arg9: memref<8x32xf32, #tpu.memory_space<vmem>>, %arg10: memref<8x32xf32, #tpu.memory_space<vmem>>, %arg11: memref<8x32xf32, #tpu.memory_space<vmem>>, %arg12: memref<8x1xi32, #tpu.memory_space<vmem>>, %arg13: memref<1xi32, #tpu.memory_space<smem>>) attributes {dimension_semantics = [], scalar_prefetch = 0 : i64, scratch_operands = 4 : i64, tpu.core_type = #tpu.core_type<tc>} {
    %c0_i32 = arith.constant 0 : i32
    %0 = vector.broadcast %c0_i32 : i32 to vector<8x8xi32>
    %c0 = arith.constant 0 : index
    %c0_0 = arith.constant 0 : index
    %1 = vector.load %arg8[%c0, %c0_0] : memref<8x8xi32, #tpu.memory_space<vmem>>, vector<8x8xi32>
    tpu.vector_store %arg8[%c0, %c0_0], %0 {strides = array<i32>} : memref<8x8xi32, #tpu.memory_space<vmem>>, vector<8x8xi32>,
    %c0_1 = arith.constant 0 : index
    %c0_2 = arith.constant 0 : index
    %2 = vector.load %arg6[%c0_1, %c0_2] : memref<8x32xf32, #tpu.memory_space<vmem>>, vector<8x32xf32>
    %c0_3 = arith.constant 0 : index
    %c0_4 = arith.constant 0 : index
    %3 = vector.load %arg10[%c0_3, %c0_4] : memref<8x32xf32, #tpu.memory_space<vmem>>, vector<8x32xf32>
    tpu.vector_store %arg10[%c0_3, %c0_4], %2 {strides = array<i32>} : memref<8x32xf32, #tpu.memory_space<vmem>>, vector<8x32xf32>,
    %c0_5 = arith.constant 0 : index
    %c0_6 = arith.constant 0 : index
    %4 = vector.load %arg7[%c0_5, %c0_6] : memref<8x32xf32, #tpu.memory_space<vmem>>, vector<8x32xf32>
    %c0_7 = arith.constant 0 : index
    %c0_8 = arith.constant 0 : index
    %5 = vector.load %arg11[%c0_7, %c0_8] : memref<8x32xf32, #tpu.memory_space<vmem>>, vector<8x32xf32>
    tpu.vector_store %arg11[%c0_7, %c0_8], %4 {strides = array<i32>} : memref<8x32xf32, #tpu.memory_space<vmem>>, vector<8x32xf32>,
    %c1_i32 = arith.constant 1 : i32
    %6 = vector.broadcast %c1_i32 : i32 to vector<8x1xi32>
    %c0_9 = arith.constant 0 : index
    %c0_10 = arith.constant 0 : index
    %7 = vector.load %arg12[%c0_9, %c0_10] : memref<8x1xi32, #tpu.memory_space<vmem>>, vector<8x1xi32>
    tpu.vector_store %arg12[%c0_9, %c0_10], %6 {strides = array<i32>} : memref<8x1xi32, #tpu.memory_space<vmem>>, vector<8x1xi32>,
    %c1_i32_11 = arith.constant 1 : i32
    %c0_12 = arith.constant 0 : index
    %8 = memref.load %arg13[%c0_12] : memref<1xi32, #tpu.memory_space<smem>>
    memref.store %c1_i32_11, %arg13[%c0_12] : memref<1xi32, #tpu.memory_space<smem>>
    %9 = tpu.iota {dimensions = array<i32: 1>} : vector<8x16xi32>
    %10 = tpu.iota {dimensions = array<i32: 1>} : vector<8x8xi32>
    %c0_13 = arith.constant 0 : index
    %c0_14 = arith.constant 0 : index
    %11 = vector.load %arg0[%c0_13, %c0_14] : memref<16x128xf32, #tpu.memory_space<vmem>>, vector<16x128xf32>
    %c0_15 = arith.constant 0 : index
    %c0_16 = arith.constant 0 : index
    %12 = vector.load %arg1[%c0_15, %c0_16] : memref<32x128xf32, #tpu.memory_space<vmem>>, vector<32x128xf32>
    %c0_17 = arith.constant 0 : index
    %c0_18 = arith.constant 0 : index
    %13 = vector.load %arg2[%c0_17, %c0_18] : memref<1x128xf32, #tpu.memory_space<vmem>>, vector<1x128xf32>
    %c0_19 = arith.constant 0 : index
    %c0_20 = arith.constant 0 : index
    %14 = vector.load %arg3[%c0_19, %c0_20] : memref<32x16xf32, #tpu.memory_space<vmem>>, vector<32x16xf32>
    %c0_21 = arith.constant 0 : index
    %c0_22 = arith.constant 0 : index
    %15 = vector.load %arg4[%c0_21, %c0_22] : memref<1x16xf32, #tpu.memory_space<vmem>>, vector<1x16xf32>
    %c0_23 = arith.constant 0 : index
    %16 = memref.load %arg13[%c0_23] : memref<1xi32, #tpu.memory_space<smem>>
    %c1_i32_24 = arith.constant 1 : i32
    %17 = arith.cmpi eq, %16, %c1_i32_24 : i32
    %18 = arith.extui %17 : i1 to i32
    %c0_i32_25 = arith.constant 0 : i32
    %19 = arith.cmpi ne, %18, %c0_i32_25 : i32
    scf.if %19 {
      %c0_51 = arith.constant 0 : index
      %c0_52 = arith.constant 0 : index
      %50 = vector.load %arg10[%c0_51, %c0_52] : memref<8x32xf32, #tpu.memory_space<vmem>>, vector<8x32xf32>
      %c0_53 = arith.constant 0 : index
      %c0_54 = arith.constant 0 : index
      %51 = vector.load %arg11[%c0_53, %c0_54] : memref<8x32xf32, #tpu.memory_space<vmem>>, vector<8x32xf32>
      %c0_55 = arith.constant 0 : index
      %c0_56 = arith.constant 0 : index
      %52 = vector.load %arg12[%c0_55, %c0_56] : memref<8x1xi32, #tpu.memory_space<vmem>>, vector<8x1xi32>
      %53 = vector.broadcast %52 : vector<8x1xi32> to vector<8x16xi32>
      %54 = arith.cmpi eq, %53, %9 : vector<8x16xi32>
      %55 = arith.extui %54 : vector<8x16xi1> to vector<8x16xi32>
      %56 = arith.sitofp %55 : vector<8x16xi32> to vector<8x16xf32>
      %cst = arith.constant dense<0.000000e+00> : vector<8x128xf32>
      %57 = tpu.matmul %56, %11, %cst {dimension_numbers = #tpu.dot_dimension_numbers<[1], [0], [0], [1], [0, 0, 1, 1], [], []>} : vector<8x16xf32>, vector<16x128xf32>, vector<8x128xf32> -> vector<8x128xf32>
      %cst_57 = arith.constant dense<0.000000e+00> : vector<8x128xf32>
      %58 = tpu.matmul %50, %12, %cst_57 {dimension_numbers = #tpu.dot_dimension_numbers<[1], [0], [0], [1], [0, 0, 1, 1], [], []>} : vector<8x32xf32>, vector<32x128xf32>, vector<8x128xf32> -> vector<8x128xf32>
      %59 = arith.addf %57, %58 : vector<8x128xf32>
      %60 = vector.broadcast %13 : vector<1x128xf32> to vector<8x128xf32>
      %61 = arith.addf %59, %60 : vector<8x128xf32>
      %62 = vector.extract_strided_slice %61 {offsets = [0, 0], sizes = [8, 96], strides = [1, 1]} : vector<8x128xf32> to vector<8x96xf32>
      %63 = arith.negf %62 : vector<8x96xf32>
      %64 = math.exp %63 : vector<8x96xf32>
      %cst_58 = arith.constant 1.000000e+00 : f32
      %65 = vector.broadcast %cst_58 : f32 to vector<8x96xf32>
      %66 = arith.addf %65, %64 : vector<8x96xf32>
      %67 = arith.divf %65, %66 : vector<8x96xf32>
      %68 = vector.extract_strided_slice %61 {offsets = [0, 96], sizes = [8, 32], strides = [1, 1]} : vector<8x128xf32> to vector<8x32xf32>
      %69 = math.tanh %68 : vector<8x32xf32>
      %70 = vector.extract_strided_slice %67 {offsets = [0, 0], sizes = [8, 32], strides = [1, 1]} : vector<8x96xf32> to vector<8x32xf32>
      %71 = vector.extract_strided_slice %67 {offsets = [0, 32], sizes = [8, 32], strides = [1, 1]} : vector<8x96xf32> to vector<8x32xf32>
      %72 = vector.extract_strided_slice %67 {offsets = [0, 64], sizes = [8, 32], strides = [1, 1]} : vector<8x96xf32> to vector<8x32xf32>
      %73 = arith.mulf %71, %51 : vector<8x32xf32>
      %74 = arith.mulf %70, %69 : vector<8x32xf32>
      %75 = arith.addf %73, %74 : vector<8x32xf32>
      %76 = math.tanh %75 : vector<8x32xf32>
      %77 = arith.mulf %72, %76 : vector<8x32xf32>
      %cst_59 = arith.constant dense<0.000000e+00> : vector<8x16xf32>
      %78 = tpu.matmul %77, %14, %cst_59 {dimension_numbers = #tpu.dot_dimension_numbers<[1], [0], [0], [1], [0, 0, 1, 1], [], []>} : vector<8x32xf32>, vector<32x16xf32>, vector<8x16xf32> -> vector<8x16xf32>
      %79 = vector.broadcast %15 : vector<1x16xf32> to vector<8x16xf32>
      %80 = arith.addf %78, %79 : vector<8x16xf32>
      %c0_60 = arith.constant 0 : index
      %c0_61 = arith.constant 0 : index
      %c0_62 = arith.constant 0 : index
      %81 = vector.load %arg5[%c0_60, %c0_61, %c0_62] : memref<8x8x16xf32, #tpu.memory_space<vmem>>, vector<1x8x16xf32>
      %82 = vector.shape_cast %81 : vector<1x8x16xf32> to vector<8x16xf32>
      %83 = arith.addf %80, %82 : vector<8x16xf32>
      %cst_63 = arith.constant dense<0xFF800000> : vector<8xf32>
      %84 = vector.multi_reduction <maximumf>, %83, %cst_63 [1] : vector<8x16xf32> to vector<8xf32>
      %85 = vector.shape_cast %84 : vector<8xf32> to vector<8x1xf32>
      %86 = vector.broadcast %85 : vector<8x1xf32> to vector<8x16xf32>
      %87 = arith.cmpf oeq, %83, %86 : vector<8x16xf32>
      %c16_i32 = arith.constant 16 : i32
      %88 = vector.broadcast %c16_i32 : i32 to vector<8x16xi32>
      %89 = arith.select %87, %9, %88 : vector<8x16xi1>, vector<8x16xi32>
      %cst_64 = arith.constant dense<2147483647> : vector<8xi32>
      %90 = vector.multi_reduction <minsi>, %89, %cst_64 [1] : vector<8x16xi32> to vector<8xi32>
      %91 = vector.shape_cast %90 : vector<8xi32> to vector<8x1xi32>
      %c0_i32_65 = arith.constant 0 : i32
      %92 = vector.broadcast %c0_i32_65 : i32 to vector<8x8xi32>
      %93 = arith.cmpi eq, %10, %92 : vector<8x8xi32>
      %c0_66 = arith.constant 0 : index
      %c0_67 = arith.constant 0 : index
      %94 = vector.load %arg8[%c0_66, %c0_67] : memref<8x8xi32, #tpu.memory_space<vmem>>, vector<8x8xi32>
      %95 = vector.shape_cast %91 : vector<8x1xi32> to vector<8x1xi32>
      %96 = vector.broadcast %95 : vector<8x1xi32> to vector<8x8xi32>
      %97 = arith.select %93, %96, %94 : vector<8x8xi1>, vector<8x8xi32>
      %c0_68 = arith.constant 0 : index
      %c0_69 = arith.constant 0 : index
      %98 = vector.load %arg8[%c0_68, %c0_69] : memref<8x8xi32, #tpu.memory_space<vmem>>, vector<8x8xi32>
      tpu.vector_store %arg8[%c0_68, %c0_69], %97 {strides = array<i32>} : memref<8x8xi32, #tpu.memory_space<vmem>>, vector<8x8xi32>,
      %c0_70 = arith.constant 0 : index
      %c0_71 = arith.constant 0 : index
      %99 = vector.load %arg10[%c0_70, %c0_71] : memref<8x32xf32, #tpu.memory_space<vmem>>, vector<8x32xf32>
      tpu.vector_store %arg10[%c0_70, %c0_71], %77 {strides = array<i32>} : memref<8x32xf32, #tpu.memory_space<vmem>>, vector<8x32xf32>,
      %c0_72 = arith.constant 0 : index
      %c0_73 = arith.constant 0 : index
      %100 = vector.load %arg11[%c0_72, %c0_73] : memref<8x32xf32, #tpu.memory_space<vmem>>, vector<8x32xf32>
      tpu.vector_store %arg11[%c0_72, %c0_73], %75 {strides = array<i32>} : memref<8x32xf32, #tpu.memory_space<vmem>>, vector<8x32xf32>,
      %c0_74 = arith.constant 0 : index
      %c0_75 = arith.constant 0 : index
      %101 = vector.load %arg12[%c0_74, %c0_75] : memref<8x1xi32, #tpu.memory_space<vmem>>, vector<8x1xi32>
      tpu.vector_store %arg12[%c0_74, %c0_75], %91 {strides = array<i32>} : memref<8x1xi32, #tpu.memory_space<vmem>>, vector<8x1xi32>,
      %102 = vector.shape_cast %91 : vector<8x1xi32> to vector<1x8x1xi32>
      %cst_76 = arith.constant dense<-2147483648> : vector<1xi32>
      %103 = vector.multi_reduction <maxsi>, %102, %cst_76 [1, 2] : vector<1x8x1xi32> to vector<1xi32>
      %104 = vector.shape_cast %103 : vector<1xi32> to vector<1x1x1xi32>
      %105 = vector.extract %104[0, 0, 0] : i32 from vector<1x1x1xi32>
      %c0_i32_77 = arith.constant 0 : i32
      %106 = arith.cmpi sgt, %105, %c0_i32_77 : i32
      %107 = arith.extui %106 : i1 to i32
      %c0_78 = arith.constant 0 : index
      %108 = memref.load %arg13[%c0_78] : memref<1xi32, #tpu.memory_space<smem>>
      memref.store %107, %arg13[%c0_78] : memref<1xi32, #tpu.memory_space<smem>>
    } else {
    }
    %c0_26 = arith.constant 0 : index
    %20 = memref.load %arg13[%c0_26] : memref<1xi32, #tpu.memory_space<smem>>
    %c1_i32_27 = arith.constant 1 : i32
    %21 = arith.cmpi eq, %20, %c1_i32_27 : i32
    %22 = arith.extui %21 : i1 to i32
    %c0_i32_28 = arith.constant 0 : i32
    %23 = arith.cmpi ne, %22, %c0_i32_28 : i32
    scf.if %23 {
      %c0_51 = arith.constant 0 : index
      %c0_52 = arith.constant 0 : index
      %50 = vector.load %arg10[%c0_51, %c0_52] : memref<8x32xf32, #tpu.memory_space<vmem>>, vector<8x32xf32>
      %c0_53 = arith.constant 0 : index
      %c0_54 = arith.constant 0 : index
      %51 = vector.load %arg11[%c0_53, %c0_54] : memref<8x32xf32, #tpu.memory_space<vmem>>, vector<8x32xf32>
      %c0_55 = arith.constant 0 : index
      %c0_56 = arith.constant 0 : index
      %52 = vector.load %arg12[%c0_55, %c0_56] : memref<8x1xi32, #tpu.memory_space<vmem>>, vector<8x1xi32>
      %53 = vector.broadcast %52 : vector<8x1xi32> to vector<8x16xi32>
      %54 = arith.cmpi eq, %53, %9 : vector<8x16xi32>
      %55 = arith.extui %54 : vector<8x16xi1> to vector<8x16xi32>
      %56 = arith.sitofp %55 : vector<8x16xi32> to vector<8x16xf32>
      %cst = arith.constant dense<0.000000e+00> : vector<8x128xf32>
      %57 = tpu.matmul %56, %11, %cst {dimension_numbers = #tpu.dot_dimension_numbers<[1], [0], [0], [1], [0, 0, 1, 1], [], []>} : vector<8x16xf32>, vector<16x128xf32>, vector<8x128xf32> -> vector<8x128xf32>
      %cst_57 = arith.constant dense<0.000000e+00> : vector<8x128xf32>
      %58 = tpu.matmul %50, %12, %cst_57 {dimension_numbers = #tpu.dot_dimension_numbers<[1], [0], [0], [1], [0, 0, 1, 1], [], []>} : vector<8x32xf32>, vector<32x128xf32>, vector<8x128xf32> -> vector<8x128xf32>
      %59 = arith.addf %57, %58 : vector<8x128xf32>
      %60 = vector.broadcast %13 : vector<1x128xf32> to vector<8x128xf32>
      %61 = arith.addf %59, %60 : vector<8x128xf32>
      %62 = vector.extract_strided_slice %61 {offsets = [0, 0], sizes = [8, 96], strides = [1, 1]} : vector<8x128xf32> to vector<8x96xf32>
      %63 = arith.negf %62 : vector<8x96xf32>
      %64 = math.exp %63 : vector<8x96xf32>
      %cst_58 = arith.constant 1.000000e+00 : f32
      %65 = vector.broadcast %cst_58 : f32 to vector<8x96xf32>
      %66 = arith.addf %65, %64 : vector<8x96xf32>
      %67 = arith.divf %65, %66 : vector<8x96xf32>
      %68 = vector.extract_strided_slice %61 {offsets = [0, 96], sizes = [8, 32], strides = [1, 1]} : vector<8x128xf32> to vector<8x32xf32>
      %69 = math.tanh %68 : vector<8x32xf32>
      %70 = vector.extract_strided_slice %67 {offsets = [0, 0], sizes = [8, 32], strides = [1, 1]} : vector<8x96xf32> to vector<8x32xf32>
      %71 = vector.extract_strided_slice %67 {offsets = [0, 32], sizes = [8, 32], strides = [1, 1]} : vector<8x96xf32> to vector<8x32xf32>
      %72 = vector.extract_strided_slice %67 {offsets = [0, 64], sizes = [8, 32], strides = [1, 1]} : vector<8x96xf32> to vector<8x32xf32>
      %73 = arith.mulf %71, %51 : vector<8x32xf32>
      %74 = arith.mulf %70, %69 : vector<8x32xf32>
      %75 = arith.addf %73, %74 : vector<8x32xf32>
      %76 = math.tanh %75 : vector<8x32xf32>
      %77 = arith.mulf %72, %76 : vector<8x32xf32>
      %cst_59 = arith.constant dense<0.000000e+00> : vector<8x16xf32>
      %78 = tpu.matmul %77, %14, %cst_59 {dimension_numbers = #tpu.dot_dimension_numbers<[1], [0], [0], [1], [0, 0, 1, 1], [], []>} : vector<8x32xf32>, vector<32x16xf32>, vector<8x16xf32> -> vector<8x16xf32>
      %79 = vector.broadcast %15 : vector<1x16xf32> to vector<8x16xf32>
      %80 = arith.addf %78, %79 : vector<8x16xf32>
      %c1 = arith.constant 1 : index
      %c0_60 = arith.constant 0 : index
      %c0_61 = arith.constant 0 : index
      %81 = vector.load %arg5[%c1, %c0_60, %c0_61] : memref<8x8x16xf32, #tpu.memory_space<vmem>>, vector<1x8x16xf32>
      %82 = vector.shape_cast %81 : vector<1x8x16xf32> to vector<8x16xf32>
      %83 = arith.addf %80, %82 : vector<8x16xf32>
      %cst_62 = arith.constant dense<0xFF800000> : vector<8xf32>
      %84 = vector.multi_reduction <maximumf>, %83, %cst_62 [1] : vector<8x16xf32> to vector<8xf32>
      %85 = vector.shape_cast %84 : vector<8xf32> to vector<8x1xf32>
      %86 = vector.broadcast %85 : vector<8x1xf32> to vector<8x16xf32>
      %87 = arith.cmpf oeq, %83, %86 : vector<8x16xf32>
      %c16_i32 = arith.constant 16 : i32
      %88 = vector.broadcast %c16_i32 : i32 to vector<8x16xi32>
      %89 = arith.select %87, %9, %88 : vector<8x16xi1>, vector<8x16xi32>
      %cst_63 = arith.constant dense<2147483647> : vector<8xi32>
      %90 = vector.multi_reduction <minsi>, %89, %cst_63 [1] : vector<8x16xi32> to vector<8xi32>
      %91 = vector.shape_cast %90 : vector<8xi32> to vector<8x1xi32>
      %c1_i32_64 = arith.constant 1 : i32
      %92 = vector.broadcast %c1_i32_64 : i32 to vector<8x8xi32>
      %93 = arith.cmpi eq, %10, %92 : vector<8x8xi32>
      %c0_65 = arith.constant 0 : index
      %c0_66 = arith.constant 0 : index
      %94 = vector.load %arg8[%c0_65, %c0_66] : memref<8x8xi32, #tpu.memory_space<vmem>>, vector<8x8xi32>
      %95 = vector.shape_cast %91 : vector<8x1xi32> to vector<8x1xi32>
      %96 = vector.broadcast %95 : vector<8x1xi32> to vector<8x8xi32>
      %97 = arith.select %93, %96, %94 : vector<8x8xi1>, vector<8x8xi32>
      %c0_67 = arith.constant 0 : index
      %c0_68 = arith.constant 0 : index
      %98 = vector.load %arg8[%c0_67, %c0_68] : memref<8x8xi32, #tpu.memory_space<vmem>>, vector<8x8xi32>
      tpu.vector_store %arg8[%c0_67, %c0_68], %97 {strides = array<i32>} : memref<8x8xi32, #tpu.memory_space<vmem>>, vector<8x8xi32>,
      %c0_69 = arith.constant 0 : index
      %c0_70 = arith.constant 0 : index
      %99 = vector.load %arg10[%c0_69, %c0_70] : memref<8x32xf32, #tpu.memory_space<vmem>>, vector<8x32xf32>
      tpu.vector_store %arg10[%c0_69, %c0_70], %77 {strides = array<i32>} : memref<8x32xf32, #tpu.memory_space<vmem>>, vector<8x32xf32>,
      %c0_71 = arith.constant 0 : index
      %c0_72 = arith.constant 0 : index
      %100 = vector.load %arg11[%c0_71, %c0_72] : memref<8x32xf32, #tpu.memory_space<vmem>>, vector<8x32xf32>
      tpu.vector_store %arg11[%c0_71, %c0_72], %75 {strides = array<i32>} : memref<8x32xf32, #tpu.memory_space<vmem>>, vector<8x32xf32>,
      %c0_73 = arith.constant 0 : index
      %c0_74 = arith.constant 0 : index
      %101 = vector.load %arg12[%c0_73, %c0_74] : memref<8x1xi32, #tpu.memory_space<vmem>>, vector<8x1xi32>
      tpu.vector_store %arg12[%c0_73, %c0_74], %91 {strides = array<i32>} : memref<8x1xi32, #tpu.memory_space<vmem>>, vector<8x1xi32>,
      %102 = vector.shape_cast %91 : vector<8x1xi32> to vector<1x8x1xi32>
      %cst_75 = arith.constant dense<-2147483648> : vector<1xi32>
      %103 = vector.multi_reduction <maxsi>, %102, %cst_75 [1, 2] : vector<1x8x1xi32> to vector<1xi32>
      %104 = vector.shape_cast %103 : vector<1xi32> to vector<1x1x1xi32>
      %105 = vector.extract %104[0, 0, 0] : i32 from vector<1x1x1xi32>
      %c0_i32_76 = arith.constant 0 : i32
      %106 = arith.cmpi sgt, %105, %c0_i32_76 : i32
      %107 = arith.extui %106 : i1 to i32
      %c0_77 = arith.constant 0 : index
      %108 = memref.load %arg13[%c0_77] : memref<1xi32, #tpu.memory_space<smem>>
      memref.store %107, %arg13[%c0_77] : memref<1xi32, #tpu.memory_space<smem>>
    } else {
    }
    %c0_29 = arith.constant 0 : index
    %24 = memref.load %arg13[%c0_29] : memref<1xi32, #tpu.memory_space<smem>>
    %c1_i32_30 = arith.constant 1 : i32
    %25 = arith.cmpi eq, %24, %c1_i32_30 : i32
    %26 = arith.extui %25 : i1 to i32
    %c0_i32_31 = arith.constant 0 : i32
    %27 = arith.cmpi ne, %26, %c0_i32_31 : i32
    scf.if %27 {
      %c0_51 = arith.constant 0 : index
      %c0_52 = arith.constant 0 : index
      %50 = vector.load %arg10[%c0_51, %c0_52] : memref<8x32xf32, #tpu.memory_space<vmem>>, vector<8x32xf32>
      %c0_53 = arith.constant 0 : index
      %c0_54 = arith.constant 0 : index
      %51 = vector.load %arg11[%c0_53, %c0_54] : memref<8x32xf32, #tpu.memory_space<vmem>>, vector<8x32xf32>
      %c0_55 = arith.constant 0 : index
      %c0_56 = arith.constant 0 : index
      %52 = vector.load %arg12[%c0_55, %c0_56] : memref<8x1xi32, #tpu.memory_space<vmem>>, vector<8x1xi32>
      %53 = vector.broadcast %52 : vector<8x1xi32> to vector<8x16xi32>
      %54 = arith.cmpi eq, %53, %9 : vector<8x16xi32>
      %55 = arith.extui %54 : vector<8x16xi1> to vector<8x16xi32>
      %56 = arith.sitofp %55 : vector<8x16xi32> to vector<8x16xf32>
      %cst = arith.constant dense<0.000000e+00> : vector<8x128xf32>
      %57 = tpu.matmul %56, %11, %cst {dimension_numbers = #tpu.dot_dimension_numbers<[1], [0], [0], [1], [0, 0, 1, 1], [], []>} : vector<8x16xf32>, vector<16x128xf32>, vector<8x128xf32> -> vector<8x128xf32>
      %cst_57 = arith.constant dense<0.000000e+00> : vector<8x128xf32>
      %58 = tpu.matmul %50, %12, %cst_57 {dimension_numbers = #tpu.dot_dimension_numbers<[1], [0], [0], [1], [0, 0, 1, 1], [], []>} : vector<8x32xf32>, vector<32x128xf32>, vector<8x128xf32> -> vector<8x128xf32>
      %59 = arith.addf %57, %58 : vector<8x128xf32>
      %60 = vector.broadcast %13 : vector<1x128xf32> to vector<8x128xf32>
      %61 = arith.addf %59, %60 : vector<8x128xf32>
      %62 = vector.extract_strided_slice %61 {offsets = [0, 0], sizes = [8, 96], strides = [1, 1]} : vector<8x128xf32> to vector<8x96xf32>
      %63 = arith.negf %62 : vector<8x96xf32>
      %64 = math.exp %63 : vector<8x96xf32>
      %cst_58 = arith.constant 1.000000e+00 : f32
      %65 = vector.broadcast %cst_58 : f32 to vector<8x96xf32>
      %66 = arith.addf %65, %64 : vector<8x96xf32>
      %67 = arith.divf %65, %66 : vector<8x96xf32>
      %68 = vector.extract_strided_slice %61 {offsets = [0, 96], sizes = [8, 32], strides = [1, 1]} : vector<8x128xf32> to vector<8x32xf32>
      %69 = math.tanh %68 : vector<8x32xf32>
      %70 = vector.extract_strided_slice %67 {offsets = [0, 0], sizes = [8, 32], strides = [1, 1]} : vector<8x96xf32> to vector<8x32xf32>
      %71 = vector.extract_strided_slice %67 {offsets = [0, 32], sizes = [8, 32], strides = [1, 1]} : vector<8x96xf32> to vector<8x32xf32>
      %72 = vector.extract_strided_slice %67 {offsets = [0, 64], sizes = [8, 32], strides = [1, 1]} : vector<8x96xf32> to vector<8x32xf32>
      %73 = arith.mulf %71, %51 : vector<8x32xf32>
      %74 = arith.mulf %70, %69 : vector<8x32xf32>
      %75 = arith.addf %73, %74 : vector<8x32xf32>
      %76 = math.tanh %75 : vector<8x32xf32>
      %77 = arith.mulf %72, %76 : vector<8x32xf32>
      %cst_59 = arith.constant dense<0.000000e+00> : vector<8x16xf32>
      %78 = tpu.matmul %77, %14, %cst_59 {dimension_numbers = #tpu.dot_dimension_numbers<[1], [0], [0], [1], [0, 0, 1, 1], [], []>} : vector<8x32xf32>, vector<32x16xf32>, vector<8x16xf32> -> vector<8x16xf32>
      %79 = vector.broadcast %15 : vector<1x16xf32> to vector<8x16xf32>
      %80 = arith.addf %78, %79 : vector<8x16xf32>
      %c2 = arith.constant 2 : index
      %c0_60 = arith.constant 0 : index
      %c0_61 = arith.constant 0 : index
      %81 = vector.load %arg5[%c2, %c0_60, %c0_61] : memref<8x8x16xf32, #tpu.memory_space<vmem>>, vector<1x8x16xf32>
      %82 = vector.shape_cast %81 : vector<1x8x16xf32> to vector<8x16xf32>
      %83 = arith.addf %80, %82 : vector<8x16xf32>
      %cst_62 = arith.constant dense<0xFF800000> : vector<8xf32>
      %84 = vector.multi_reduction <maximumf>, %83, %cst_62 [1] : vector<8x16xf32> to vector<8xf32>
      %85 = vector.shape_cast %84 : vector<8xf32> to vector<8x1xf32>
      %86 = vector.broadcast %85 : vector<8x1xf32> to vector<8x16xf32>
      %87 = arith.cmpf oeq, %83, %86 : vector<8x16xf32>
      %c16_i32 = arith.constant 16 : i32
      %88 = vector.broadcast %c16_i32 : i32 to vector<8x16xi32>
      %89 = arith.select %87, %9, %88 : vector<8x16xi1>, vector<8x16xi32>
      %cst_63 = arith.constant dense<2147483647> : vector<8xi32>
      %90 = vector.multi_reduction <minsi>, %89, %cst_63 [1] : vector<8x16xi32> to vector<8xi32>
      %91 = vector.shape_cast %90 : vector<8xi32> to vector<8x1xi32>
      %c2_i32 = arith.constant 2 : i32
      %92 = vector.broadcast %c2_i32 : i32 to vector<8x8xi32>
      %93 = arith.cmpi eq, %10, %92 : vector<8x8xi32>
      %c0_64 = arith.constant 0 : index
      %c0_65 = arith.constant 0 : index
      %94 = vector.load %arg8[%c0_64, %c0_65] : memref<8x8xi32, #tpu.memory_space<vmem>>, vector<8x8xi32>
      %95 = vector.shape_cast %91 : vector<8x1xi32> to vector<8x1xi32>
      %96 = vector.broadcast %95 : vector<8x1xi32> to vector<8x8xi32>
      %97 = arith.select %93, %96, %94 : vector<8x8xi1>, vector<8x8xi32>
      %c0_66 = arith.constant 0 : index
      %c0_67 = arith.constant 0 : index
      %98 = vector.load %arg8[%c0_66, %c0_67] : memref<8x8xi32, #tpu.memory_space<vmem>>, vector<8x8xi32>
      tpu.vector_store %arg8[%c0_66, %c0_67], %97 {strides = array<i32>} : memref<8x8xi32, #tpu.memory_space<vmem>>, vector<8x8xi32>,
      %c0_68 = arith.constant 0 : index
      %c0_69 = arith.constant 0 : index
      %99 = vector.load %arg10[%c0_68, %c0_69] : memref<8x32xf32, #tpu.memory_space<vmem>>, vector<8x32xf32>
      tpu.vector_store %arg10[%c0_68, %c0_69], %77 {strides = array<i32>} : memref<8x32xf32, #tpu.memory_space<vmem>>, vector<8x32xf32>,
      %c0_70 = arith.constant 0 : index
      %c0_71 = arith.constant 0 : index
      %100 = vector.load %arg11[%c0_70, %c0_71] : memref<8x32xf32, #tpu.memory_space<vmem>>, vector<8x32xf32>
      tpu.vector_store %arg11[%c0_70, %c0_71], %75 {strides = array<i32>} : memref<8x32xf32, #tpu.memory_space<vmem>>, vector<8x32xf32>,
      %c0_72 = arith.constant 0 : index
      %c0_73 = arith.constant 0 : index
      %101 = vector.load %arg12[%c0_72, %c0_73] : memref<8x1xi32, #tpu.memory_space<vmem>>, vector<8x1xi32>
      tpu.vector_store %arg12[%c0_72, %c0_73], %91 {strides = array<i32>} : memref<8x1xi32, #tpu.memory_space<vmem>>, vector<8x1xi32>,
      %102 = vector.shape_cast %91 : vector<8x1xi32> to vector<1x8x1xi32>
      %cst_74 = arith.constant dense<-2147483648> : vector<1xi32>
      %103 = vector.multi_reduction <maxsi>, %102, %cst_74 [1, 2] : vector<1x8x1xi32> to vector<1xi32>
      %104 = vector.shape_cast %103 : vector<1xi32> to vector<1x1x1xi32>
      %105 = vector.extract %104[0, 0, 0] : i32 from vector<1x1x1xi32>
      %c0_i32_75 = arith.constant 0 : i32
      %106 = arith.cmpi sgt, %105, %c0_i32_75 : i32
      %107 = arith.extui %106 : i1 to i32
      %c0_76 = arith.constant 0 : index
      %108 = memref.load %arg13[%c0_76] : memref<1xi32, #tpu.memory_space<smem>>
      memref.store %107, %arg13[%c0_76] : memref<1xi32, #tpu.memory_space<smem>>
    } else {
    }
    %c0_32 = arith.constant 0 : index
    %28 = memref.load %arg13[%c0_32] : memref<1xi32, #tpu.memory_space<smem>>
    %c1_i32_33 = arith.constant 1 : i32
    %29 = arith.cmpi eq, %28, %c1_i32_33 : i32
    %30 = arith.extui %29 : i1 to i32
    %c0_i32_34 = arith.constant 0 : i32
    %31 = arith.cmpi ne, %30, %c0_i32_34 : i32
    scf.if %31 {
      %c0_51 = arith.constant 0 : index
      %c0_52 = arith.constant 0 : index
      %50 = vector.load %arg10[%c0_51, %c0_52] : memref<8x32xf32, #tpu.memory_space<vmem>>, vector<8x32xf32>
      %c0_53 = arith.constant 0 : index
      %c0_54 = arith.constant 0 : index
      %51 = vector.load %arg11[%c0_53, %c0_54] : memref<8x32xf32, #tpu.memory_space<vmem>>, vector<8x32xf32>
      %c0_55 = arith.constant 0 : index
      %c0_56 = arith.constant 0 : index
      %52 = vector.load %arg12[%c0_55, %c0_56] : memref<8x1xi32, #tpu.memory_space<vmem>>, vector<8x1xi32>
      %53 = vector.broadcast %52 : vector<8x1xi32> to vector<8x16xi32>
      %54 = arith.cmpi eq, %53, %9 : vector<8x16xi32>
      %55 = arith.extui %54 : vector<8x16xi1> to vector<8x16xi32>
      %56 = arith.sitofp %55 : vector<8x16xi32> to vector<8x16xf32>
      %cst = arith.constant dense<0.000000e+00> : vector<8x128xf32>
      %57 = tpu.matmul %56, %11, %cst {dimension_numbers = #tpu.dot_dimension_numbers<[1], [0], [0], [1], [0, 0, 1, 1], [], []>} : vector<8x16xf32>, vector<16x128xf32>, vector<8x128xf32> -> vector<8x128xf32>
      %cst_57 = arith.constant dense<0.000000e+00> : vector<8x128xf32>
      %58 = tpu.matmul %50, %12, %cst_57 {dimension_numbers = #tpu.dot_dimension_numbers<[1], [0], [0], [1], [0, 0, 1, 1], [], []>} : vector<8x32xf32>, vector<32x128xf32>, vector<8x128xf32> -> vector<8x128xf32>
      %59 = arith.addf %57, %58 : vector<8x128xf32>
      %60 = vector.broadcast %13 : vector<1x128xf32> to vector<8x128xf32>
      %61 = arith.addf %59, %60 : vector<8x128xf32>
      %62 = vector.extract_strided_slice %61 {offsets = [0, 0], sizes = [8, 96], strides = [1, 1]} : vector<8x128xf32> to vector<8x96xf32>
      %63 = arith.negf %62 : vector<8x96xf32>
      %64 = math.exp %63 : vector<8x96xf32>
      %cst_58 = arith.constant 1.000000e+00 : f32
      %65 = vector.broadcast %cst_58 : f32 to vector<8x96xf32>
      %66 = arith.addf %65, %64 : vector<8x96xf32>
      %67 = arith.divf %65, %66 : vector<8x96xf32>
      %68 = vector.extract_strided_slice %61 {offsets = [0, 96], sizes = [8, 32], strides = [1, 1]} : vector<8x128xf32> to vector<8x32xf32>
      %69 = math.tanh %68 : vector<8x32xf32>
      %70 = vector.extract_strided_slice %67 {offsets = [0, 0], sizes = [8, 32], strides = [1, 1]} : vector<8x96xf32> to vector<8x32xf32>
      %71 = vector.extract_strided_slice %67 {offsets = [0, 32], sizes = [8, 32], strides = [1, 1]} : vector<8x96xf32> to vector<8x32xf32>
      %72 = vector.extract_strided_slice %67 {offsets = [0, 64], sizes = [8, 32], strides = [1, 1]} : vector<8x96xf32> to vector<8x32xf32>
      %73 = arith.mulf %71, %51 : vector<8x32xf32>
      %74 = arith.mulf %70, %69 : vector<8x32xf32>
      %75 = arith.addf %73, %74 : vector<8x32xf32>
      %76 = math.tanh %75 : vector<8x32xf32>
      %77 = arith.mulf %72, %76 : vector<8x32xf32>
      %cst_59 = arith.constant dense<0.000000e+00> : vector<8x16xf32>
      %78 = tpu.matmul %77, %14, %cst_59 {dimension_numbers = #tpu.dot_dimension_numbers<[1], [0], [0], [1], [0, 0, 1, 1], [], []>} : vector<8x32xf32>, vector<32x16xf32>, vector<8x16xf32> -> vector<8x16xf32>
      %79 = vector.broadcast %15 : vector<1x16xf32> to vector<8x16xf32>
      %80 = arith.addf %78, %79 : vector<8x16xf32>
      %c3 = arith.constant 3 : index
      %c0_60 = arith.constant 0 : index
      %c0_61 = arith.constant 0 : index
      %81 = vector.load %arg5[%c3, %c0_60, %c0_61] : memref<8x8x16xf32, #tpu.memory_space<vmem>>, vector<1x8x16xf32>
      %82 = vector.shape_cast %81 : vector<1x8x16xf32> to vector<8x16xf32>
      %83 = arith.addf %80, %82 : vector<8x16xf32>
      %cst_62 = arith.constant dense<0xFF800000> : vector<8xf32>
      %84 = vector.multi_reduction <maximumf>, %83, %cst_62 [1] : vector<8x16xf32> to vector<8xf32>
      %85 = vector.shape_cast %84 : vector<8xf32> to vector<8x1xf32>
      %86 = vector.broadcast %85 : vector<8x1xf32> to vector<8x16xf32>
      %87 = arith.cmpf oeq, %83, %86 : vector<8x16xf32>
      %c16_i32 = arith.constant 16 : i32
      %88 = vector.broadcast %c16_i32 : i32 to vector<8x16xi32>
      %89 = arith.select %87, %9, %88 : vector<8x16xi1>, vector<8x16xi32>
      %cst_63 = arith.constant dense<2147483647> : vector<8xi32>
      %90 = vector.multi_reduction <minsi>, %89, %cst_63 [1] : vector<8x16xi32> to vector<8xi32>
      %91 = vector.shape_cast %90 : vector<8xi32> to vector<8x1xi32>
      %c3_i32 = arith.constant 3 : i32
      %92 = vector.broadcast %c3_i32 : i32 to vector<8x8xi32>
      %93 = arith.cmpi eq, %10, %92 : vector<8x8xi32>
      %c0_64 = arith.constant 0 : index
      %c0_65 = arith.constant 0 : index
      %94 = vector.load %arg8[%c0_64, %c0_65] : memref<8x8xi32, #tpu.memory_space<vmem>>, vector<8x8xi32>
      %95 = vector.shape_cast %91 : vector<8x1xi32> to vector<8x1xi32>
      %96 = vector.broadcast %95 : vector<8x1xi32> to vector<8x8xi32>
      %97 = arith.select %93, %96, %94 : vector<8x8xi1>, vector<8x8xi32>
      %c0_66 = arith.constant 0 : index
      %c0_67 = arith.constant 0 : index
      %98 = vector.load %arg8[%c0_66, %c0_67] : memref<8x8xi32, #tpu.memory_space<vmem>>, vector<8x8xi32>
      tpu.vector_store %arg8[%c0_66, %c0_67], %97 {strides = array<i32>} : memref<8x8xi32, #tpu.memory_space<vmem>>, vector<8x8xi32>,
      %c0_68 = arith.constant 0 : index
      %c0_69 = arith.constant 0 : index
      %99 = vector.load %arg10[%c0_68, %c0_69] : memref<8x32xf32, #tpu.memory_space<vmem>>, vector<8x32xf32>
      tpu.vector_store %arg10[%c0_68, %c0_69], %77 {strides = array<i32>} : memref<8x32xf32, #tpu.memory_space<vmem>>, vector<8x32xf32>,
      %c0_70 = arith.constant 0 : index
      %c0_71 = arith.constant 0 : index
      %100 = vector.load %arg11[%c0_70, %c0_71] : memref<8x32xf32, #tpu.memory_space<vmem>>, vector<8x32xf32>
      tpu.vector_store %arg11[%c0_70, %c0_71], %75 {strides = array<i32>} : memref<8x32xf32, #tpu.memory_space<vmem>>, vector<8x32xf32>,
      %c0_72 = arith.constant 0 : index
      %c0_73 = arith.constant 0 : index
      %101 = vector.load %arg12[%c0_72, %c0_73] : memref<8x1xi32, #tpu.memory_space<vmem>>, vector<8x1xi32>
      tpu.vector_store %arg12[%c0_72, %c0_73], %91 {strides = array<i32>} : memref<8x1xi32, #tpu.memory_space<vmem>>, vector<8x1xi32>,
      %102 = vector.shape_cast %91 : vector<8x1xi32> to vector<1x8x1xi32>
      %cst_74 = arith.constant dense<-2147483648> : vector<1xi32>
      %103 = vector.multi_reduction <maxsi>, %102, %cst_74 [1, 2] : vector<1x8x1xi32> to vector<1xi32>
      %104 = vector.shape_cast %103 : vector<1xi32> to vector<1x1x1xi32>
      %105 = vector.extract %104[0, 0, 0] : i32 from vector<1x1x1xi32>
      %c0_i32_75 = arith.constant 0 : i32
      %106 = arith.cmpi sgt, %105, %c0_i32_75 : i32
      %107 = arith.extui %106 : i1 to i32
      %c0_76 = arith.constant 0 : index
      %108 = memref.load %arg13[%c0_76] : memref<1xi32, #tpu.memory_space<smem>>
      memref.store %107, %arg13[%c0_76] : memref<1xi32, #tpu.memory_space<smem>>
    } else {
    }
    %c0_35 = arith.constant 0 : index
    %32 = memref.load %arg13[%c0_35] : memref<1xi32, #tpu.memory_space<smem>>
    %c1_i32_36 = arith.constant 1 : i32
    %33 = arith.cmpi eq, %32, %c1_i32_36 : i32
    %34 = arith.extui %33 : i1 to i32
    %c0_i32_37 = arith.constant 0 : i32
    %35 = arith.cmpi ne, %34, %c0_i32_37 : i32
    scf.if %35 {
      %c0_51 = arith.constant 0 : index
      %c0_52 = arith.constant 0 : index
      %50 = vector.load %arg10[%c0_51, %c0_52] : memref<8x32xf32, #tpu.memory_space<vmem>>, vector<8x32xf32>
      %c0_53 = arith.constant 0 : index
      %c0_54 = arith.constant 0 : index
      %51 = vector.load %arg11[%c0_53, %c0_54] : memref<8x32xf32, #tpu.memory_space<vmem>>, vector<8x32xf32>
      %c0_55 = arith.constant 0 : index
      %c0_56 = arith.constant 0 : index
      %52 = vector.load %arg12[%c0_55, %c0_56] : memref<8x1xi32, #tpu.memory_space<vmem>>, vector<8x1xi32>
      %53 = vector.broadcast %52 : vector<8x1xi32> to vector<8x16xi32>
      %54 = arith.cmpi eq, %53, %9 : vector<8x16xi32>
      %55 = arith.extui %54 : vector<8x16xi1> to vector<8x16xi32>
      %56 = arith.sitofp %55 : vector<8x16xi32> to vector<8x16xf32>
      %cst = arith.constant dense<0.000000e+00> : vector<8x128xf32>
      %57 = tpu.matmul %56, %11, %cst {dimension_numbers = #tpu.dot_dimension_numbers<[1], [0], [0], [1], [0, 0, 1, 1], [], []>} : vector<8x16xf32>, vector<16x128xf32>, vector<8x128xf32> -> vector<8x128xf32>
      %cst_57 = arith.constant dense<0.000000e+00> : vector<8x128xf32>
      %58 = tpu.matmul %50, %12, %cst_57 {dimension_numbers = #tpu.dot_dimension_numbers<[1], [0], [0], [1], [0, 0, 1, 1], [], []>} : vector<8x32xf32>, vector<32x128xf32>, vector<8x128xf32> -> vector<8x128xf32>
      %59 = arith.addf %57, %58 : vector<8x128xf32>
      %60 = vector.broadcast %13 : vector<1x128xf32> to vector<8x128xf32>
      %61 = arith.addf %59, %60 : vector<8x128xf32>
      %62 = vector.extract_strided_slice %61 {offsets = [0, 0], sizes = [8, 96], strides = [1, 1]} : vector<8x128xf32> to vector<8x96xf32>
      %63 = arith.negf %62 : vector<8x96xf32>
      %64 = math.exp %63 : vector<8x96xf32>
      %cst_58 = arith.constant 1.000000e+00 : f32
      %65 = vector.broadcast %cst_58 : f32 to vector<8x96xf32>
      %66 = arith.addf %65, %64 : vector<8x96xf32>
      %67 = arith.divf %65, %66 : vector<8x96xf32>
      %68 = vector.extract_strided_slice %61 {offsets = [0, 96], sizes = [8, 32], strides = [1, 1]} : vector<8x128xf32> to vector<8x32xf32>
      %69 = math.tanh %68 : vector<8x32xf32>
      %70 = vector.extract_strided_slice %67 {offsets = [0, 0], sizes = [8, 32], strides = [1, 1]} : vector<8x96xf32> to vector<8x32xf32>
      %71 = vector.extract_strided_slice %67 {offsets = [0, 32], sizes = [8, 32], strides = [1, 1]} : vector<8x96xf32> to vector<8x32xf32>
      %72 = vector.extract_strided_slice %67 {offsets = [0, 64], sizes = [8, 32], strides = [1, 1]} : vector<8x96xf32> to vector<8x32xf32>
      %73 = arith.mulf %71, %51 : vector<8x32xf32>
      %74 = arith.mulf %70, %69 : vector<8x32xf32>
      %75 = arith.addf %73, %74 : vector<8x32xf32>
      %76 = math.tanh %75 : vector<8x32xf32>
      %77 = arith.mulf %72, %76 : vector<8x32xf32>
      %cst_59 = arith.constant dense<0.000000e+00> : vector<8x16xf32>
      %78 = tpu.matmul %77, %14, %cst_59 {dimension_numbers = #tpu.dot_dimension_numbers<[1], [0], [0], [1], [0, 0, 1, 1], [], []>} : vector<8x32xf32>, vector<32x16xf32>, vector<8x16xf32> -> vector<8x16xf32>
      %79 = vector.broadcast %15 : vector<1x16xf32> to vector<8x16xf32>
      %80 = arith.addf %78, %79 : vector<8x16xf32>
      %c4 = arith.constant 4 : index
      %c0_60 = arith.constant 0 : index
      %c0_61 = arith.constant 0 : index
      %81 = vector.load %arg5[%c4, %c0_60, %c0_61] : memref<8x8x16xf32, #tpu.memory_space<vmem>>, vector<1x8x16xf32>
      %82 = vector.shape_cast %81 : vector<1x8x16xf32> to vector<8x16xf32>
      %83 = arith.addf %80, %82 : vector<8x16xf32>
      %cst_62 = arith.constant dense<0xFF800000> : vector<8xf32>
      %84 = vector.multi_reduction <maximumf>, %83, %cst_62 [1] : vector<8x16xf32> to vector<8xf32>
      %85 = vector.shape_cast %84 : vector<8xf32> to vector<8x1xf32>
      %86 = vector.broadcast %85 : vector<8x1xf32> to vector<8x16xf32>
      %87 = arith.cmpf oeq, %83, %86 : vector<8x16xf32>
      %c16_i32 = arith.constant 16 : i32
      %88 = vector.broadcast %c16_i32 : i32 to vector<8x16xi32>
      %89 = arith.select %87, %9, %88 : vector<8x16xi1>, vector<8x16xi32>
      %cst_63 = arith.constant dense<2147483647> : vector<8xi32>
      %90 = vector.multi_reduction <minsi>, %89, %cst_63 [1] : vector<8x16xi32> to vector<8xi32>
      %91 = vector.shape_cast %90 : vector<8xi32> to vector<8x1xi32>
      %c4_i32 = arith.constant 4 : i32
      %92 = vector.broadcast %c4_i32 : i32 to vector<8x8xi32>
      %93 = arith.cmpi eq, %10, %92 : vector<8x8xi32>
      %c0_64 = arith.constant 0 : index
      %c0_65 = arith.constant 0 : index
      %94 = vector.load %arg8[%c0_64, %c0_65] : memref<8x8xi32, #tpu.memory_space<vmem>>, vector<8x8xi32>
      %95 = vector.shape_cast %91 : vector<8x1xi32> to vector<8x1xi32>
      %96 = vector.broadcast %95 : vector<8x1xi32> to vector<8x8xi32>
      %97 = arith.select %93, %96, %94 : vector<8x8xi1>, vector<8x8xi32>
      %c0_66 = arith.constant 0 : index
      %c0_67 = arith.constant 0 : index
      %98 = vector.load %arg8[%c0_66, %c0_67] : memref<8x8xi32, #tpu.memory_space<vmem>>, vector<8x8xi32>
      tpu.vector_store %arg8[%c0_66, %c0_67], %97 {strides = array<i32>} : memref<8x8xi32, #tpu.memory_space<vmem>>, vector<8x8xi32>,
      %c0_68 = arith.constant 0 : index
      %c0_69 = arith.constant 0 : index
      %99 = vector.load %arg10[%c0_68, %c0_69] : memref<8x32xf32, #tpu.memory_space<vmem>>, vector<8x32xf32>
      tpu.vector_store %arg10[%c0_68, %c0_69], %77 {strides = array<i32>} : memref<8x32xf32, #tpu.memory_space<vmem>>, vector<8x32xf32>,
      %c0_70 = arith.constant 0 : index
      %c0_71 = arith.constant 0 : index
      %100 = vector.load %arg11[%c0_70, %c0_71] : memref<8x32xf32, #tpu.memory_space<vmem>>, vector<8x32xf32>
      tpu.vector_store %arg11[%c0_70, %c0_71], %75 {strides = array<i32>} : memref<8x32xf32, #tpu.memory_space<vmem>>, vector<8x32xf32>,
      %c0_72 = arith.constant 0 : index
      %c0_73 = arith.constant 0 : index
      %101 = vector.load %arg12[%c0_72, %c0_73] : memref<8x1xi32, #tpu.memory_space<vmem>>, vector<8x1xi32>
      tpu.vector_store %arg12[%c0_72, %c0_73], %91 {strides = array<i32>} : memref<8x1xi32, #tpu.memory_space<vmem>>, vector<8x1xi32>,
      %102 = vector.shape_cast %91 : vector<8x1xi32> to vector<1x8x1xi32>
      %cst_74 = arith.constant dense<-2147483648> : vector<1xi32>
      %103 = vector.multi_reduction <maxsi>, %102, %cst_74 [1, 2] : vector<1x8x1xi32> to vector<1xi32>
      %104 = vector.shape_cast %103 : vector<1xi32> to vector<1x1x1xi32>
      %105 = vector.extract %104[0, 0, 0] : i32 from vector<1x1x1xi32>
      %c0_i32_75 = arith.constant 0 : i32
      %106 = arith.cmpi sgt, %105, %c0_i32_75 : i32
      %107 = arith.extui %106 : i1 to i32
      %c0_76 = arith.constant 0 : index
      %108 = memref.load %arg13[%c0_76] : memref<1xi32, #tpu.memory_space<smem>>
      memref.store %107, %arg13[%c0_76] : memref<1xi32, #tpu.memory_space<smem>>
    } else {
    }
    %c0_38 = arith.constant 0 : index
    %36 = memref.load %arg13[%c0_38] : memref<1xi32, #tpu.memory_space<smem>>
    %c1_i32_39 = arith.constant 1 : i32
    %37 = arith.cmpi eq, %36, %c1_i32_39 : i32
    %38 = arith.extui %37 : i1 to i32
    %c0_i32_40 = arith.constant 0 : i32
    %39 = arith.cmpi ne, %38, %c0_i32_40 : i32
    scf.if %39 {
      %c0_51 = arith.constant 0 : index
      %c0_52 = arith.constant 0 : index
      %50 = vector.load %arg10[%c0_51, %c0_52] : memref<8x32xf32, #tpu.memory_space<vmem>>, vector<8x32xf32>
      %c0_53 = arith.constant 0 : index
      %c0_54 = arith.constant 0 : index
      %51 = vector.load %arg11[%c0_53, %c0_54] : memref<8x32xf32, #tpu.memory_space<vmem>>, vector<8x32xf32>
      %c0_55 = arith.constant 0 : index
      %c0_56 = arith.constant 0 : index
      %52 = vector.load %arg12[%c0_55, %c0_56] : memref<8x1xi32, #tpu.memory_space<vmem>>, vector<8x1xi32>
      %53 = vector.broadcast %52 : vector<8x1xi32> to vector<8x16xi32>
      %54 = arith.cmpi eq, %53, %9 : vector<8x16xi32>
      %55 = arith.extui %54 : vector<8x16xi1> to vector<8x16xi32>
      %56 = arith.sitofp %55 : vector<8x16xi32> to vector<8x16xf32>
      %cst = arith.constant dense<0.000000e+00> : vector<8x128xf32>
      %57 = tpu.matmul %56, %11, %cst {dimension_numbers = #tpu.dot_dimension_numbers<[1], [0], [0], [1], [0, 0, 1, 1], [], []>} : vector<8x16xf32>, vector<16x128xf32>, vector<8x128xf32> -> vector<8x128xf32>
      %cst_57 = arith.constant dense<0.000000e+00> : vector<8x128xf32>
      %58 = tpu.matmul %50, %12, %cst_57 {dimension_numbers = #tpu.dot_dimension_numbers<[1], [0], [0], [1], [0, 0, 1, 1], [], []>} : vector<8x32xf32>, vector<32x128xf32>, vector<8x128xf32> -> vector<8x128xf32>
      %59 = arith.addf %57, %58 : vector<8x128xf32>
      %60 = vector.broadcast %13 : vector<1x128xf32> to vector<8x128xf32>
      %61 = arith.addf %59, %60 : vector<8x128xf32>
      %62 = vector.extract_strided_slice %61 {offsets = [0, 0], sizes = [8, 96], strides = [1, 1]} : vector<8x128xf32> to vector<8x96xf32>
      %63 = arith.negf %62 : vector<8x96xf32>
      %64 = math.exp %63 : vector<8x96xf32>
      %cst_58 = arith.constant 1.000000e+00 : f32
      %65 = vector.broadcast %cst_58 : f32 to vector<8x96xf32>
      %66 = arith.addf %65, %64 : vector<8x96xf32>
      %67 = arith.divf %65, %66 : vector<8x96xf32>
      %68 = vector.extract_strided_slice %61 {offsets = [0, 96], sizes = [8, 32], strides = [1, 1]} : vector<8x128xf32> to vector<8x32xf32>
      %69 = math.tanh %68 : vector<8x32xf32>
      %70 = vector.extract_strided_slice %67 {offsets = [0, 0], sizes = [8, 32], strides = [1, 1]} : vector<8x96xf32> to vector<8x32xf32>
      %71 = vector.extract_strided_slice %67 {offsets = [0, 32], sizes = [8, 32], strides = [1, 1]} : vector<8x96xf32> to vector<8x32xf32>
      %72 = vector.extract_strided_slice %67 {offsets = [0, 64], sizes = [8, 32], strides = [1, 1]} : vector<8x96xf32> to vector<8x32xf32>
      %73 = arith.mulf %71, %51 : vector<8x32xf32>
      %74 = arith.mulf %70, %69 : vector<8x32xf32>
      %75 = arith.addf %73, %74 : vector<8x32xf32>
      %76 = math.tanh %75 : vector<8x32xf32>
      %77 = arith.mulf %72, %76 : vector<8x32xf32>
      %cst_59 = arith.constant dense<0.000000e+00> : vector<8x16xf32>
      %78 = tpu.matmul %77, %14, %cst_59 {dimension_numbers = #tpu.dot_dimension_numbers<[1], [0], [0], [1], [0, 0, 1, 1], [], []>} : vector<8x32xf32>, vector<32x16xf32>, vector<8x16xf32> -> vector<8x16xf32>
      %79 = vector.broadcast %15 : vector<1x16xf32> to vector<8x16xf32>
      %80 = arith.addf %78, %79 : vector<8x16xf32>
      %c5 = arith.constant 5 : index
      %c0_60 = arith.constant 0 : index
      %c0_61 = arith.constant 0 : index
      %81 = vector.load %arg5[%c5, %c0_60, %c0_61] : memref<8x8x16xf32, #tpu.memory_space<vmem>>, vector<1x8x16xf32>
      %82 = vector.shape_cast %81 : vector<1x8x16xf32> to vector<8x16xf32>
      %83 = arith.addf %80, %82 : vector<8x16xf32>
      %cst_62 = arith.constant dense<0xFF800000> : vector<8xf32>
      %84 = vector.multi_reduction <maximumf>, %83, %cst_62 [1] : vector<8x16xf32> to vector<8xf32>
      %85 = vector.shape_cast %84 : vector<8xf32> to vector<8x1xf32>
      %86 = vector.broadcast %85 : vector<8x1xf32> to vector<8x16xf32>
      %87 = arith.cmpf oeq, %83, %86 : vector<8x16xf32>
      %c16_i32 = arith.constant 16 : i32
      %88 = vector.broadcast %c16_i32 : i32 to vector<8x16xi32>
      %89 = arith.select %87, %9, %88 : vector<8x16xi1>, vector<8x16xi32>
      %cst_63 = arith.constant dense<2147483647> : vector<8xi32>
      %90 = vector.multi_reduction <minsi>, %89, %cst_63 [1] : vector<8x16xi32> to vector<8xi32>
      %91 = vector.shape_cast %90 : vector<8xi32> to vector<8x1xi32>
      %c5_i32 = arith.constant 5 : i32
      %92 = vector.broadcast %c5_i32 : i32 to vector<8x8xi32>
      %93 = arith.cmpi eq, %10, %92 : vector<8x8xi32>
      %c0_64 = arith.constant 0 : index
      %c0_65 = arith.constant 0 : index
      %94 = vector.load %arg8[%c0_64, %c0_65] : memref<8x8xi32, #tpu.memory_space<vmem>>, vector<8x8xi32>
      %95 = vector.shape_cast %91 : vector<8x1xi32> to vector<8x1xi32>
      %96 = vector.broadcast %95 : vector<8x1xi32> to vector<8x8xi32>
      %97 = arith.select %93, %96, %94 : vector<8x8xi1>, vector<8x8xi32>
      %c0_66 = arith.constant 0 : index
      %c0_67 = arith.constant 0 : index
      %98 = vector.load %arg8[%c0_66, %c0_67] : memref<8x8xi32, #tpu.memory_space<vmem>>, vector<8x8xi32>
      tpu.vector_store %arg8[%c0_66, %c0_67], %97 {strides = array<i32>} : memref<8x8xi32, #tpu.memory_space<vmem>>, vector<8x8xi32>,
      %c0_68 = arith.constant 0 : index
      %c0_69 = arith.constant 0 : index
      %99 = vector.load %arg10[%c0_68, %c0_69] : memref<8x32xf32, #tpu.memory_space<vmem>>, vector<8x32xf32>
      tpu.vector_store %arg10[%c0_68, %c0_69], %77 {strides = array<i32>} : memref<8x32xf32, #tpu.memory_space<vmem>>, vector<8x32xf32>,
      %c0_70 = arith.constant 0 : index
      %c0_71 = arith.constant 0 : index
      %100 = vector.load %arg11[%c0_70, %c0_71] : memref<8x32xf32, #tpu.memory_space<vmem>>, vector<8x32xf32>
      tpu.vector_store %arg11[%c0_70, %c0_71], %75 {strides = array<i32>} : memref<8x32xf32, #tpu.memory_space<vmem>>, vector<8x32xf32>,
      %c0_72 = arith.constant 0 : index
      %c0_73 = arith.constant 0 : index
      %101 = vector.load %arg12[%c0_72, %c0_73] : memref<8x1xi32, #tpu.memory_space<vmem>>, vector<8x1xi32>
      tpu.vector_store %arg12[%c0_72, %c0_73], %91 {strides = array<i32>} : memref<8x1xi32, #tpu.memory_space<vmem>>, vector<8x1xi32>,
      %102 = vector.shape_cast %91 : vector<8x1xi32> to vector<1x8x1xi32>
      %cst_74 = arith.constant dense<-2147483648> : vector<1xi32>
      %103 = vector.multi_reduction <maxsi>, %102, %cst_74 [1, 2] : vector<1x8x1xi32> to vector<1xi32>
      %104 = vector.shape_cast %103 : vector<1xi32> to vector<1x1x1xi32>
      %105 = vector.extract %104[0, 0, 0] : i32 from vector<1x1x1xi32>
      %c0_i32_75 = arith.constant 0 : i32
      %106 = arith.cmpi sgt, %105, %c0_i32_75 : i32
      %107 = arith.extui %106 : i1 to i32
      %c0_76 = arith.constant 0 : index
      %108 = memref.load %arg13[%c0_76] : memref<1xi32, #tpu.memory_space<smem>>
      memref.store %107, %arg13[%c0_76] : memref<1xi32, #tpu.memory_space<smem>>
    } else {
    }
    %c0_41 = arith.constant 0 : index
    %40 = memref.load %arg13[%c0_41] : memref<1xi32, #tpu.memory_space<smem>>
    %c1_i32_42 = arith.constant 1 : i32
    %41 = arith.cmpi eq, %40, %c1_i32_42 : i32
    %42 = arith.extui %41 : i1 to i32
    %c0_i32_43 = arith.constant 0 : i32
    %43 = arith.cmpi ne, %42, %c0_i32_43 : i32
    scf.if %43 {
      %c0_51 = arith.constant 0 : index
      %c0_52 = arith.constant 0 : index
      %50 = vector.load %arg10[%c0_51, %c0_52] : memref<8x32xf32, #tpu.memory_space<vmem>>, vector<8x32xf32>
      %c0_53 = arith.constant 0 : index
      %c0_54 = arith.constant 0 : index
      %51 = vector.load %arg11[%c0_53, %c0_54] : memref<8x32xf32, #tpu.memory_space<vmem>>, vector<8x32xf32>
      %c0_55 = arith.constant 0 : index
      %c0_56 = arith.constant 0 : index
      %52 = vector.load %arg12[%c0_55, %c0_56] : memref<8x1xi32, #tpu.memory_space<vmem>>, vector<8x1xi32>
      %53 = vector.broadcast %52 : vector<8x1xi32> to vector<8x16xi32>
      %54 = arith.cmpi eq, %53, %9 : vector<8x16xi32>
      %55 = arith.extui %54 : vector<8x16xi1> to vector<8x16xi32>
      %56 = arith.sitofp %55 : vector<8x16xi32> to vector<8x16xf32>
      %cst = arith.constant dense<0.000000e+00> : vector<8x128xf32>
      %57 = tpu.matmul %56, %11, %cst {dimension_numbers = #tpu.dot_dimension_numbers<[1], [0], [0], [1], [0, 0, 1, 1], [], []>} : vector<8x16xf32>, vector<16x128xf32>, vector<8x128xf32> -> vector<8x128xf32>
      %cst_57 = arith.constant dense<0.000000e+00> : vector<8x128xf32>
      %58 = tpu.matmul %50, %12, %cst_57 {dimension_numbers = #tpu.dot_dimension_numbers<[1], [0], [0], [1], [0, 0, 1, 1], [], []>} : vector<8x32xf32>, vector<32x128xf32>, vector<8x128xf32> -> vector<8x128xf32>
      %59 = arith.addf %57, %58 : vector<8x128xf32>
      %60 = vector.broadcast %13 : vector<1x128xf32> to vector<8x128xf32>
      %61 = arith.addf %59, %60 : vector<8x128xf32>
      %62 = vector.extract_strided_slice %61 {offsets = [0, 0], sizes = [8, 96], strides = [1, 1]} : vector<8x128xf32> to vector<8x96xf32>
      %63 = arith.negf %62 : vector<8x96xf32>
      %64 = math.exp %63 : vector<8x96xf32>
      %cst_58 = arith.constant 1.000000e+00 : f32
      %65 = vector.broadcast %cst_58 : f32 to vector<8x96xf32>
      %66 = arith.addf %65, %64 : vector<8x96xf32>
      %67 = arith.divf %65, %66 : vector<8x96xf32>
      %68 = vector.extract_strided_slice %61 {offsets = [0, 96], sizes = [8, 32], strides = [1, 1]} : vector<8x128xf32> to vector<8x32xf32>
      %69 = math.tanh %68 : vector<8x32xf32>
      %70 = vector.extract_strided_slice %67 {offsets = [0, 0], sizes = [8, 32], strides = [1, 1]} : vector<8x96xf32> to vector<8x32xf32>
      %71 = vector.extract_strided_slice %67 {offsets = [0, 32], sizes = [8, 32], strides = [1, 1]} : vector<8x96xf32> to vector<8x32xf32>
      %72 = vector.extract_strided_slice %67 {offsets = [0, 64], sizes = [8, 32], strides = [1, 1]} : vector<8x96xf32> to vector<8x32xf32>
      %73 = arith.mulf %71, %51 : vector<8x32xf32>
      %74 = arith.mulf %70, %69 : vector<8x32xf32>
      %75 = arith.addf %73, %74 : vector<8x32xf32>
      %76 = math.tanh %75 : vector<8x32xf32>
      %77 = arith.mulf %72, %76 : vector<8x32xf32>
      %cst_59 = arith.constant dense<0.000000e+00> : vector<8x16xf32>
      %78 = tpu.matmul %77, %14, %cst_59 {dimension_numbers = #tpu.dot_dimension_numbers<[1], [0], [0], [1], [0, 0, 1, 1], [], []>} : vector<8x32xf32>, vector<32x16xf32>, vector<8x16xf32> -> vector<8x16xf32>
      %79 = vector.broadcast %15 : vector<1x16xf32> to vector<8x16xf32>
      %80 = arith.addf %78, %79 : vector<8x16xf32>
      %c6 = arith.constant 6 : index
      %c0_60 = arith.constant 0 : index
      %c0_61 = arith.constant 0 : index
      %81 = vector.load %arg5[%c6, %c0_60, %c0_61] : memref<8x8x16xf32, #tpu.memory_space<vmem>>, vector<1x8x16xf32>
      %82 = vector.shape_cast %81 : vector<1x8x16xf32> to vector<8x16xf32>
      %83 = arith.addf %80, %82 : vector<8x16xf32>
      %cst_62 = arith.constant dense<0xFF800000> : vector<8xf32>
      %84 = vector.multi_reduction <maximumf>, %83, %cst_62 [1] : vector<8x16xf32> to vector<8xf32>
      %85 = vector.shape_cast %84 : vector<8xf32> to vector<8x1xf32>
      %86 = vector.broadcast %85 : vector<8x1xf32> to vector<8x16xf32>
      %87 = arith.cmpf oeq, %83, %86 : vector<8x16xf32>
      %c16_i32 = arith.constant 16 : i32
      %88 = vector.broadcast %c16_i32 : i32 to vector<8x16xi32>
      %89 = arith.select %87, %9, %88 : vector<8x16xi1>, vector<8x16xi32>
      %cst_63 = arith.constant dense<2147483647> : vector<8xi32>
      %90 = vector.multi_reduction <minsi>, %89, %cst_63 [1] : vector<8x16xi32> to vector<8xi32>
      %91 = vector.shape_cast %90 : vector<8xi32> to vector<8x1xi32>
      %c6_i32 = arith.constant 6 : i32
      %92 = vector.broadcast %c6_i32 : i32 to vector<8x8xi32>
      %93 = arith.cmpi eq, %10, %92 : vector<8x8xi32>
      %c0_64 = arith.constant 0 : index
      %c0_65 = arith.constant 0 : index
      %94 = vector.load %arg8[%c0_64, %c0_65] : memref<8x8xi32, #tpu.memory_space<vmem>>, vector<8x8xi32>
      %95 = vector.shape_cast %91 : vector<8x1xi32> to vector<8x1xi32>
      %96 = vector.broadcast %95 : vector<8x1xi32> to vector<8x8xi32>
      %97 = arith.select %93, %96, %94 : vector<8x8xi1>, vector<8x8xi32>
      %c0_66 = arith.constant 0 : index
      %c0_67 = arith.constant 0 : index
      %98 = vector.load %arg8[%c0_66, %c0_67] : memref<8x8xi32, #tpu.memory_space<vmem>>, vector<8x8xi32>
      tpu.vector_store %arg8[%c0_66, %c0_67], %97 {strides = array<i32>} : memref<8x8xi32, #tpu.memory_space<vmem>>, vector<8x8xi32>,
      %c0_68 = arith.constant 0 : index
      %c0_69 = arith.constant 0 : index
      %99 = vector.load %arg10[%c0_68, %c0_69] : memref<8x32xf32, #tpu.memory_space<vmem>>, vector<8x32xf32>
      tpu.vector_store %arg10[%c0_68, %c0_69], %77 {strides = array<i32>} : memref<8x32xf32, #tpu.memory_space<vmem>>, vector<8x32xf32>,
      %c0_70 = arith.constant 0 : index
      %c0_71 = arith.constant 0 : index
      %100 = vector.load %arg11[%c0_70, %c0_71] : memref<8x32xf32, #tpu.memory_space<vmem>>, vector<8x32xf32>
      tpu.vector_store %arg11[%c0_70, %c0_71], %75 {strides = array<i32>} : memref<8x32xf32, #tpu.memory_space<vmem>>, vector<8x32xf32>,
      %c0_72 = arith.constant 0 : index
      %c0_73 = arith.constant 0 : index
      %101 = vector.load %arg12[%c0_72, %c0_73] : memref<8x1xi32, #tpu.memory_space<vmem>>, vector<8x1xi32>
      tpu.vector_store %arg12[%c0_72, %c0_73], %91 {strides = array<i32>} : memref<8x1xi32, #tpu.memory_space<vmem>>, vector<8x1xi32>,
      %102 = vector.shape_cast %91 : vector<8x1xi32> to vector<1x8x1xi32>
      %cst_74 = arith.constant dense<-2147483648> : vector<1xi32>
      %103 = vector.multi_reduction <maxsi>, %102, %cst_74 [1, 2] : vector<1x8x1xi32> to vector<1xi32>
      %104 = vector.shape_cast %103 : vector<1xi32> to vector<1x1x1xi32>
      %105 = vector.extract %104[0, 0, 0] : i32 from vector<1x1x1xi32>
      %c0_i32_75 = arith.constant 0 : i32
      %106 = arith.cmpi sgt, %105, %c0_i32_75 : i32
      %107 = arith.extui %106 : i1 to i32
      %c0_76 = arith.constant 0 : index
      %108 = memref.load %arg13[%c0_76] : memref<1xi32, #tpu.memory_space<smem>>
      memref.store %107, %arg13[%c0_76] : memref<1xi32, #tpu.memory_space<smem>>
    } else {
    }
    %c0_44 = arith.constant 0 : index
    %44 = memref.load %arg13[%c0_44] : memref<1xi32, #tpu.memory_space<smem>>
    %c1_i32_45 = arith.constant 1 : i32
    %45 = arith.cmpi eq, %44, %c1_i32_45 : i32
    %46 = arith.extui %45 : i1 to i32
    %c0_i32_46 = arith.constant 0 : i32
    %47 = arith.cmpi ne, %46, %c0_i32_46 : i32
    scf.if %47 {
      %c0_51 = arith.constant 0 : index
      %c0_52 = arith.constant 0 : index
      %50 = vector.load %arg10[%c0_51, %c0_52] : memref<8x32xf32, #tpu.memory_space<vmem>>, vector<8x32xf32>
      %c0_53 = arith.constant 0 : index
      %c0_54 = arith.constant 0 : index
      %51 = vector.load %arg11[%c0_53, %c0_54] : memref<8x32xf32, #tpu.memory_space<vmem>>, vector<8x32xf32>
      %c0_55 = arith.constant 0 : index
      %c0_56 = arith.constant 0 : index
      %52 = vector.load %arg12[%c0_55, %c0_56] : memref<8x1xi32, #tpu.memory_space<vmem>>, vector<8x1xi32>
      %53 = vector.broadcast %52 : vector<8x1xi32> to vector<8x16xi32>
      %54 = arith.cmpi eq, %53, %9 : vector<8x16xi32>
      %55 = arith.extui %54 : vector<8x16xi1> to vector<8x16xi32>
      %56 = arith.sitofp %55 : vector<8x16xi32> to vector<8x16xf32>
      %cst = arith.constant dense<0.000000e+00> : vector<8x128xf32>
      %57 = tpu.matmul %56, %11, %cst {dimension_numbers = #tpu.dot_dimension_numbers<[1], [0], [0], [1], [0, 0, 1, 1], [], []>} : vector<8x16xf32>, vector<16x128xf32>, vector<8x128xf32> -> vector<8x128xf32>
      %cst_57 = arith.constant dense<0.000000e+00> : vector<8x128xf32>
      %58 = tpu.matmul %50, %12, %cst_57 {dimension_numbers = #tpu.dot_dimension_numbers<[1], [0], [0], [1], [0, 0, 1, 1], [], []>} : vector<8x32xf32>, vector<32x128xf32>, vector<8x128xf32> -> vector<8x128xf32>
      %59 = arith.addf %57, %58 : vector<8x128xf32>
      %60 = vector.broadcast %13 : vector<1x128xf32> to vector<8x128xf32>
      %61 = arith.addf %59, %60 : vector<8x128xf32>
      %62 = vector.extract_strided_slice %61 {offsets = [0, 0], sizes = [8, 96], strides = [1, 1]} : vector<8x128xf32> to vector<8x96xf32>
      %63 = arith.negf %62 : vector<8x96xf32>
      %64 = math.exp %63 : vector<8x96xf32>
      %cst_58 = arith.constant 1.000000e+00 : f32
      %65 = vector.broadcast %cst_58 : f32 to vector<8x96xf32>
      %66 = arith.addf %65, %64 : vector<8x96xf32>
      %67 = arith.divf %65, %66 : vector<8x96xf32>
      %68 = vector.extract_strided_slice %61 {offsets = [0, 96], sizes = [8, 32], strides = [1, 1]} : vector<8x128xf32> to vector<8x32xf32>
      %69 = math.tanh %68 : vector<8x32xf32>
      %70 = vector.extract_strided_slice %67 {offsets = [0, 0], sizes = [8, 32], strides = [1, 1]} : vector<8x96xf32> to vector<8x32xf32>
      %71 = vector.extract_strided_slice %67 {offsets = [0, 32], sizes = [8, 32], strides = [1, 1]} : vector<8x96xf32> to vector<8x32xf32>
      %72 = vector.extract_strided_slice %67 {offsets = [0, 64], sizes = [8, 32], strides = [1, 1]} : vector<8x96xf32> to vector<8x32xf32>
      %73 = arith.mulf %71, %51 : vector<8x32xf32>
      %74 = arith.mulf %70, %69 : vector<8x32xf32>
      %75 = arith.addf %73, %74 : vector<8x32xf32>
      %76 = math.tanh %75 : vector<8x32xf32>
      %77 = arith.mulf %72, %76 : vector<8x32xf32>
      %cst_59 = arith.constant dense<0.000000e+00> : vector<8x16xf32>
      %78 = tpu.matmul %77, %14, %cst_59 {dimension_numbers = #tpu.dot_dimension_numbers<[1], [0], [0], [1], [0, 0, 1, 1], [], []>} : vector<8x32xf32>, vector<32x16xf32>, vector<8x16xf32> -> vector<8x16xf32>
      %79 = vector.broadcast %15 : vector<1x16xf32> to vector<8x16xf32>
      %80 = arith.addf %78, %79 : vector<8x16xf32>
      %c7 = arith.constant 7 : index
      %c0_60 = arith.constant 0 : index
      %c0_61 = arith.constant 0 : index
      %81 = vector.load %arg5[%c7, %c0_60, %c0_61] : memref<8x8x16xf32, #tpu.memory_space<vmem>>, vector<1x8x16xf32>
      %82 = vector.shape_cast %81 : vector<1x8x16xf32> to vector<8x16xf32>
      %83 = arith.addf %80, %82 : vector<8x16xf32>
      %cst_62 = arith.constant dense<0xFF800000> : vector<8xf32>
      %84 = vector.multi_reduction <maximumf>, %83, %cst_62 [1] : vector<8x16xf32> to vector<8xf32>
      %85 = vector.shape_cast %84 : vector<8xf32> to vector<8x1xf32>
      %86 = vector.broadcast %85 : vector<8x1xf32> to vector<8x16xf32>
      %87 = arith.cmpf oeq, %83, %86 : vector<8x16xf32>
      %c16_i32 = arith.constant 16 : i32
      %88 = vector.broadcast %c16_i32 : i32 to vector<8x16xi32>
      %89 = arith.select %87, %9, %88 : vector<8x16xi1>, vector<8x16xi32>
      %cst_63 = arith.constant dense<2147483647> : vector<8xi32>
      %90 = vector.multi_reduction <minsi>, %89, %cst_63 [1] : vector<8x16xi32> to vector<8xi32>
      %91 = vector.shape_cast %90 : vector<8xi32> to vector<8x1xi32>
      %c7_i32 = arith.constant 7 : i32
      %92 = vector.broadcast %c7_i32 : i32 to vector<8x8xi32>
      %93 = arith.cmpi eq, %10, %92 : vector<8x8xi32>
      %c0_64 = arith.constant 0 : index
      %c0_65 = arith.constant 0 : index
      %94 = vector.load %arg8[%c0_64, %c0_65] : memref<8x8xi32, #tpu.memory_space<vmem>>, vector<8x8xi32>
      %95 = vector.shape_cast %91 : vector<8x1xi32> to vector<8x1xi32>
      %96 = vector.broadcast %95 : vector<8x1xi32> to vector<8x8xi32>
      %97 = arith.select %93, %96, %94 : vector<8x8xi1>, vector<8x8xi32>
      %c0_66 = arith.constant 0 : index
      %c0_67 = arith.constant 0 : index
      %98 = vector.load %arg8[%c0_66, %c0_67] : memref<8x8xi32, #tpu.memory_space<vmem>>, vector<8x8xi32>
      tpu.vector_store %arg8[%c0_66, %c0_67], %97 {strides = array<i32>} : memref<8x8xi32, #tpu.memory_space<vmem>>, vector<8x8xi32>,
      %c0_68 = arith.constant 0 : index
      %c0_69 = arith.constant 0 : index
      %99 = vector.load %arg10[%c0_68, %c0_69] : memref<8x32xf32, #tpu.memory_space<vmem>>, vector<8x32xf32>
      tpu.vector_store %arg10[%c0_68, %c0_69], %77 {strides = array<i32>} : memref<8x32xf32, #tpu.memory_space<vmem>>, vector<8x32xf32>,
      %c0_70 = arith.constant 0 : index
      %c0_71 = arith.constant 0 : index
      %100 = vector.load %arg11[%c0_70, %c0_71] : memref<8x32xf32, #tpu.memory_space<vmem>>, vector<8x32xf32>
      tpu.vector_store %arg11[%c0_70, %c0_71], %75 {strides = array<i32>} : memref<8x32xf32, #tpu.memory_space<vmem>>, vector<8x32xf32>,
      %c0_72 = arith.constant 0 : index
      %c0_73 = arith.constant 0 : index
      %101 = vector.load %arg12[%c0_72, %c0_73] : memref<8x1xi32, #tpu.memory_space<vmem>>, vector<8x1xi32>
      tpu.vector_store %arg12[%c0_72, %c0_73], %91 {strides = array<i32>} : memref<8x1xi32, #tpu.memory_space<vmem>>, vector<8x1xi32>,
      %102 = vector.shape_cast %91 : vector<8x1xi32> to vector<1x8x1xi32>
      %cst_74 = arith.constant dense<-2147483648> : vector<1xi32>
      %103 = vector.multi_reduction <maxsi>, %102, %cst_74 [1, 2] : vector<1x8x1xi32> to vector<1xi32>
      %104 = vector.shape_cast %103 : vector<1xi32> to vector<1x1x1xi32>
      %105 = vector.extract %104[0, 0, 0] : i32 from vector<1x1x1xi32>
      %c0_i32_75 = arith.constant 0 : i32
      %106 = arith.cmpi sgt, %105, %c0_i32_75 : i32
      %107 = arith.extui %106 : i1 to i32
      %c0_76 = arith.constant 0 : index
      %108 = memref.load %arg13[%c0_76] : memref<1xi32, #tpu.memory_space<smem>>
      memref.store %107, %arg13[%c0_76] : memref<1xi32, #tpu.memory_space<smem>>
    } else {
    }
    %c0_47 = arith.constant 0 : index
    %c0_48 = arith.constant 0 : index
    %48 = vector.load %arg10[%c0_47, %c0_48] : memref<8x32xf32, #tpu.memory_space<vmem>>, vector<8x32xf32>
    %c0_49 = arith.constant 0 : index
    %c0_50 = arith.constant 0 : index
    %49 = vector.load %arg9[%c0_49, %c0_50] : memref<8x32xf32, #tpu.memory_space<vmem>>, vector<8x32xf32>
    tpu.vector_store %arg9[%c0_49, %c0_50], %48 {strides = array<i32>} : memref<8x32xf32, #tpu.memory_space<vmem>>, vector<8x32xf32>,
    return
  }
}

</mosaic_0001>

<bundles_post_ra>
// kernel: tpu_custom_call.1
= control target key start
LH: loop header
LB: loop body
LE: loop exit
PB: predicated region body
PF: predicated region fallthrough
CT: control target
= control target key end

     0   :  { %15 = vsyncpa [#allocation7], 0  ;;  %s2315_s0 = inlined_call_operand.vmem [shape: f32[16,128], index: 0, kind: input, shape index: {}]   ;;  %s2316_s1 = inlined_call_operand.vmem [shape: f32[32,128], index: 1, kind: input, shape index: {}]   ;;  %s2317_s2 = inlined_call_operand.vmem [shape: f32[1,128], index: 2, kind: input, shape index: {}]   ;;  %s2318_s3 = inlined_call_operand.vmem [shape: f32[32,16], index: 3, kind: input, shape index: {}]   ;;  %s2319_s4 = inlined_call_operand.vmem [shape: f32[1,16], index: 4, kind: input, shape index: {}]   ;;  %s2320_s5 = inlined_call_operand.hbm [shape: f32[8,8,16], index: 5, kind: input, shape index: {}]   ;;  %s2321_s6 = inlined_call_operand.hbm [shape: f32[8,32], index: 6, kind: input, shape index: {}]   ;;  %s2322_s7 = inlined_call_operand.hbm [shape: f32[8,32], index: 7, kind: input, shape index: {}]   ;;  %s2323_s8 = inlined_call_operand.hbm [shape: s32[8,8], index: 8, kind: output, shape index: {0}]   ;;  %s2324_s9 = inlined_call_operand.hbm [shape: f32[8,32], index: 9, kind: output, shape index: {1}]  }
   0x1   :  { %16 = vsyncpa [#allocation10], 0 }
   0x2   :  { %17 = vsyncpa [#allocation8], 0  ;;  %s47_s11 = sshll.u32 %s2321_s6, 4  ;;  %s48_s11 = int_to_ptr.hbm [resolvable:$true] %s47_s11 }
   0x3   :  { %18 = vsyncpa [#allocation14], 0  ;;  %s1907_s12 = smov [#allocation9]   ;;  %s33_s16 = sshll.u32 %s2320_s5, 4  ;;  %s34_s16 = int_to_ptr.hbm [resolvable:$true] %s33_s16 }
   0x4   :  { %s49_s13 = sshll.u32 %s1907_s12, 4  ;;  %s1908_s17 = smov [#allocation6]   ;;  %s50_s13 = int_to_ptr.vmem [resolvable:$true] %s49_s13 }
   0x5   :  { %52 = dma.hbm_to_vmem [thread:$0]  %s48_s11, 128, %s50_s13, [#allocation10]  }
   0x6   :  { %s35_s18 = sshll.u32 %s1908_s17, 4  ;;  %s1909_s19 = smov 128   ;;  %s36_s18 = int_to_ptr.vmem [resolvable:$true] %s35_s18 }
   0x7   :  { %s1910_s20 = smov 8   ;;  %s58_s6 = sshll.u32 %s2322_s7, 4  ;;  %s59_s6 = int_to_ptr.hbm [resolvable:$true] %s58_s6 }
   0x8   :  { %41 = dma.hbm_to_vmem [thread:$0]  %s34_s16, 1024, %s36_s18, [#allocation7], %s1909_s19, %s1909_s19, %s1910_s20  }
   0x9   :  { %s1911_s23 = smov [#allocation11]  }
   0xa   :  { %s60_s24 = sshll.u32 %s1911_s23, 4  ;;  %s61_s24 = int_to_ptr.vmem [resolvable:$true] %s60_s24 }
   0xb   :  { %63 = dma.hbm_to_vmem [thread:$0]  %s59_s6, 128, %s61_s24, [#allocation10]  }
   0xc   :  { %1899 = dma.done.wait [#allocation7], 1024  }
   0xd   :  { %1900 = vsyncadd [#allocation7], 4294966272 }
   0xe   :  { %1901 = dma.done.wait [#allocation10], 256  }
   0xf   :  { %1902 = vsyncadd [#allocation10], 4294967040  ;;  %vm76_vm0 = vcmask 64512   ;;  %v87_v0 = vlaneseq  ;;  %s1912_s5 = smov 1   ;;  %v1913_v1 = vmov 0   ;;  %vm83_vm1 = vcmask 7168  }
  0x10   :  { %86 = sst [smem:[#allocation5]] %s1912_s5  ;;  %77 = vst.msk [vmem:[#allocation12] sm:$0xff] %vm76_vm0, %v1913_v1  ;;  %v1914_v2 = vmov 1   ;;  %v2022_v4 = vld [vmem:[%s2315_s0] sm:$0xff]  ;;  %v2027_v5 = vld [vmem:[%s2315_s0 + $0x8] sm:$0xff]  ;;  %v2042_v8 = vld [vmem:[%s2316_s1 + $0x10] sm:$0xff]  ;;  %1706 = vset.pattern.permute.xlu0 %v1913_v1 }
  0x11   :  { %84 = vst.msk [vmem:[#allocation4] sm:$0xff] %vm83_vm1, %v1914_v2  ;;  %v2017_v3 = vand.u32 127, %v87_v0  ;;  %v2032_v6 = vld [vmem:[%s2316_s1] sm:$0xff]  ;;  %v2037_v7 = vld [vmem:[%s2316_s1 + $0x8] sm:$0xff]  ;;  %v2047_v9 = vld [vmem:[%s2316_s1 + $0x18] sm:$0xff]  ;;  %vm79_vm2 = vcmask 261120   ;;  %156 = vmatpush.msra.mxu1 %v2027_v5 }
  0x12   :  { %v95_v10 = vld [vmem:[%s2317_s2] sm:$0x1]  ;;  %v2060_v12 = vld [vmem:[%s2318_s3 + $0x8] sm:$0xff]  ;;  %v2065_v13 = vld [vmem:[%s2318_s3 + $0x10] sm:$0xff]  ;;  %130 = vmatpush.msra.mxu0 %v2047_v9  ;;  %vm138_vm3 = vcmask 130048   ;;  %v1916_v22 = vmov 0.0  }
  0x13   :  { %v2055_v11 = vld [vmem:[%s2318_s3] sm:$0xff]  ;;  %v2070_v14 = vld [vmem:[%s2318_s3 + $0x18] sm:$0xff]  ;;  %157 = vmatpush.msra.mxu1 %v2022_v4  ;;  %s1915_s3 = smov 32   ;;  %v2093_v25 = vperm.slane %v95_v10, 0  ;;  %s1918_s23 = smov 96   ;;  %vm257_vm11 = vcmp.eq.s32.totalorder %v2017_v3, 0 }
  0x14   :  { %v2075_v15 = vld [vmem:[%s2319_s4] sm:$0x1]  ;;  %v78_v16 = vld [vmem:[#allocation9] sm:$0xff]  ;;  %227 = vmatpush.msra.mxu2 %v2070_v14  ;;  %131 = vmatpush.msra.mxu0 %v2042_v8  ;;  %s1917_s4 = smov 64  }
  0x15   :  { %v81_v17 = vld [vmem:[#allocation11] sm:$0xff]  ;;  %80 = vst.msk [vmem:[#allocation2] sm:$0xff] %vm79_vm2, %v78_v16  ;;  %v2102_v53 = vperm.slane %v2075_v15, 0  ;;  %v235_v55 = vld [vmem:[#allocation6] sm:$0xff] }
  0x16   :  { %82 = vst.msk [vmem:[#allocation3] sm:$0xff] %vm79_vm2, %v81_v17  ;;  %228 = vmatpush.msra.mxu2 %v2065_v13  ;;  %132 = vmatpush.msra.mxu0 %v2037_v7 }
  0x18   :  { %v108_v18 = vld [vmem:[#allocation4] sm:$0xff]  ;;  %229 = vmatpush.msra.mxu2 %v2060_v12  ;;  %133 = vmatpush.msra.mxu0 %v2032_v6 }
  0x19   :  { %110 = vperm.xlu0 %1706, %v108_v18  }
  0x1a   :  { %230 = vmatpush.msra.mxu2 %v2055_v11 }
  0x1c   :  { %v106_v19 = vld [vmem:[#allocation2] sm:$0xff] }
  0x1d   :  { %1594 = vmatmul.msk.f32.vlgmr.msra.gmra.mxu0 %vm79_vm2, %v106_v19  ;;  %v107_v20 = vld [vmem:[#allocation3] sm:$0xff] }
  0x1e   :  { %187 = vrot.lane.b32.xlu1 %v107_v20, %s1915_s3  ;;  %v258_v19 = vld [vmem:[#allocation12] sm:$0xff] }
  0x8b   :  { %v111_v21 = vpop.permute.xlu0 %110 }
  0x8c   :  { %vm112_vm4 = vcmp.eq.s32.totalorder %v111_v21, %v2017_v3 }
  0x8d   :  { %v1593_v23 = vsel %vm112_vm4, 1.0, %v1916_v22 }
  0x8e   :  { %1595 = vmatmul.msk.f32.vlgmr.msra.gmra.mxu1 %vm138_vm3, %v1593_v23 }
  0x90   :  { %v188_v45 = vpop.permute.xlu1 %187 }
  0x9a   :  { %v135_v24 = vpop.f32.mrf.mxu0 }
 0x10b   :  { %v159_v26 = vpop.f32.mrf.mxu1 }
 0x10c   :  { %v160_v27 = vadd.f32 %v159_v26, %v135_v24 }
 0x10e   :  { %v165_v28 = vadd.f32 %v2093_v25, %v160_v27 }
 0x110   :  { %1707 = vtanh.f32 %v165_v28  ;;  %v1596_v30 = vmul.f32 -1.442695, %v165_v28 }
 0x112   :  { %1709 = vpow2.f32 %v1596_v30 }
 0x116   :  { %v1708_v29 = vpop.eup %1707 }
 0x117   :  { %192 = vrot.lane.b32.xlu0 %v1708_v29, %s1915_s3 }
 0x118   :  { %v1710_v31 = vpop.eup %1709 }
 0x119   :  { %v169_v32 = vadd.f32 1.0, %v1710_v31 }
 0x11b   :  { %1711 = vrcp.f32 %v169_v32  ;;  %v181_v38 = vand.u32 2147483648, %v169_v32  ;;  %vm175_vm6 = vweird.f32 %v169_v32  ;;  %v179_v39 = vand.u32 2147483647, %v169_v32 }
 0x11d   :  { %v182_v41 = vor.u32 1.1754944e-38, %v181_v38  ;;  %vm180_vm8 = vcmp.eq.f32.partialorder %v179_v39, 8.507059e+37 }
 0x121   :  { %v1712_v33 = vpop.eup %1711 }
 0x122   :  { %v171_v34 = vmul.f32 %v1712_v33, %v169_v32  ;;  %vm176_vm5 = vweird.f32 %v1712_v33 }
 0x123   :  { %vm177_vm7 = vmor %vm175_vm6, %vm176_vm5 }
 0x124   :  { %v172_v35 = vsub.f32 1.0, %v171_v34 }
 0x126   :  { %v173_v36 = vmul.f32 %v1712_v33, %v172_v35 }
 0x128   :  { %v174_v37 = vadd.f32 %v1712_v33, %v173_v36 }
 0x12a   :  { %v178_v40 = vsel %vm177_vm7, %v1712_v33, %v174_v37 }
 0x12b   :  { %v183_v42 = vsel %vm180_vm8, %v182_v41, %v178_v40 }
 0x12c   :  { %v190_v46 = vmul.f32 %v188_v45, %v183_v42 }
 0x189   :  { %v193_v43 = vpop.permute.xlu0 %192 }
 0x18a   :  { %v195_v44 = vmul.f32 %v193_v43, %v183_v42 }
 0x18c   :  { %197 = vrot.lane.b32.xlu1 %v195_v44, %s1915_s3 }
 0x1fe   :  { %v198_v47 = vpop.permute.xlu1 %197 }
 0x1ff   :  { %v200_v48 = vadd.f32 %v198_v47, %v190_v46 }
 0x201   :  { %1713 = vtanh.f32 %v200_v48 }
 0x207   :  { %v1714_v49 = vpop.eup %1713 }
 0x208   :  { %203 = vrot.lane.b32.xlu2 %v1714_v49, %s1915_s3 }
 0x262   :  { %v204_v50 = vpop.permute.xlu2 %203 }
 0x263   :  { %v206_v51 = vmul.f32 %v204_v50, %v183_v42 }
 0x265   :  { %211 = vrot.lane.b32.xlu2 %v206_v51, %s1917_s4 }
 0x2bf   :  { %v212_v52 = vpop.permute.xlu2 %211 }
 0x2c0   :  { %262 = vst.msk [vmem:[#allocation2] sm:$0xff] %vm79_vm2, %v212_v52  ;;  %1597 = vmatmul.msk.f32.vlgmr.msra.gmra.mxu2 %vm79_vm2, %v212_v52 }
 0x343   :  { %v232_v54 = vpop.f32.mrf.mxu2 }
 0x344   :  { %v233_v56 = vadd.f32 %v232_v54, %v2102_v53 }
 0x346   :  { %v236_v57 = vadd.f32 %v235_v55, %v233_v56 }
 0x348   :  { %v237_v58 = vsel %vm138_vm3, %v236_v57, -inf }
 0x349   :  { %238 = vmax.xlane.f32.xlu0 %v237_v58 }
 0x3bc   :  { %v239_v59 = vpop.xlane.xlu0 %238 }
 0x3bd   :  { %vm240_vm9 = vcmp.eq.f32.partialorder %v236_v57, %v239_v59 }
 0x3be   :  { %v241_v60 = vsel %vm240_vm9, %v2017_v3, 16 }
 0x3bf   :  { %v242_v61 = vsel %vm138_vm3, %v241_v60, 2147483647 }
 0x3c0   :  { %v244_v62 = vshra.s32 %v242_v61, 16  ;;  %v243_v0 = vand.u32 65535, %v242_v61 }
 0x3c2   :  { %v246_v63 = vcvt.s32.f32 %v244_v62  ;;  %v245_v2 = vcvt.s32.f32 %v243_v0 }
 0x3c4   :  { %247 = vmin.xlane.f32.xlu1 %v246_v63 }
 0x437   :  { %v248_v1 = vpop.xlane.xlu1 %247 }
 0x438   :  { %vm249_vm10 = vcmp.eq.f32.partialorder %v246_v63, %v248_v1  ;;  %v254_v15 = vcvt.f32.s32 %v248_v1 }
 0x439   :  { %v250_v10 = vsel %vm249_vm10, %v245_v2, inf }
 0x43a   :  { %251 = vmin.xlane.f32.xlu2 %v250_v10  ;;  %v255_v17 = vshll.u32 %v254_v15, 16 }
 0x452   :  { %264 = vrot.lane.b32.xlu2 %v200_v48, %s1918_s23 }
 0x4ad   :  { %v252_v16 = vpop.xlane.xlu2 %251 }
 0x4ae   :  { %v253_v18 = vcvt.f32.s32 %v252_v16 }
 0x4b0   :  { %v256_v20 = vadd.s32 %v255_v17, %v253_v18 }
 0x4b2   :  { %v259_v21 = vsel %vm257_vm11, %v256_v20, %v258_v19  ;;  %268 = vst.msk [vmem:[#allocation4] sm:$0xff] %vm83_vm1, %v256_v20  ;;  %v269_v22 = vrot.slane %v256_v20, 4 }
 0x4b3   :  { %260 = vst.msk [vmem:[#allocation12] sm:$0xff] %vm76_vm0, %v259_v21 }
 0x4b4   :  { %vm270_vm12 = vcmp.gt.s32.totalorder %v256_v20, %v269_v22 }
 0x4b5   :  { %v265_v23 = vpop.permute.xlu2 %264  ;;  %v271_v24 = vsel %vm270_vm12, %v256_v20, %v269_v22 }
 0x4b6   :  { %267 = vst.msk [vmem:[#allocation3] sm:$0xff] %vm79_vm2, %v265_v23  ;;  %v272_v26 = vrot.slane %v271_v24, 2 }
 0x4b8   :  { %vm273_vm13 = vcmp.gt.s32.totalorder %v271_v24, %v272_v26 }
 0x4b9   :  { %v274_v27 = vsel %vm273_vm13, %v271_v24, %v272_v26 }
 0x4ba   :  { %v275_v28 = vrot.slane %v274_v27, 1 }
 0x4bc   :  { %vm276_vm14 = vcmp.gt.s32.totalorder %v274_v27, %v275_v28 }
 0x4bd   :  { %v277_v29 = vsel %vm276_vm14, %v274_v27, %v275_v28 }
 0x4be   :  { %1640 = vpush %v277_v29 }
 0x4ef   :  { %s1641_s24 = spop %1640 }
 0x4f0   :  { %p279_p0 = scmp.gt.s32.totalorder %s1641_s24, 0 }
 0x4f2   :  { %s280_s5 = scalar_select %p279_p0, 1, 0 }
 0x4f4   :  { %281 = sst [smem:[#allocation5]] %s280_s5 }
 0x4f5   :  { %s282_s7 = sld [smem:[#allocation5]] }
 0x4fb   :  { %p1598_p1 = scmp.ne.s32.totalorder %s282_s7, 1 }
 0x4fc   :  { %s1920_s25 = smov (!%p1598_p1), 32   ;;  %s1922_s26 = smov (!%p1598_p1), 64  }
 0x4fd   :  { %286 = sbr.rel (%p1598_p1) target bundleno = 2528 (0x9e0), region = 53  ;;  %s1923_s27 = smov (!%p1598_p1), 96  }
 0x502   :  { %v289_v30 = vld [vmem:[#allocation4] sm:$0xff]  ;;  %311 = vmatpush.msra.mxu0 %v2047_v9  ;;  %337 = vmatpush.msra.mxu1 %v2027_v5  ;;  %v1919_v31 = vmov 0   ;;  %v287_v32 = vld [vmem:[#allocation2] sm:$0xff]  ;;  %v288_v33 = vld [vmem:[#allocation3] sm:$0xff]  ;;  %v1921_v35 = vmov 0.0   ;;  %vm439_vm10 = vcmp.eq.s32.totalorder %v2017_v3, 1 }
 0x503   :  { %1715 = vset.pattern.permute.xlu0 %v1919_v31  ;;  %408 = vmatpush.msra.mxu2 %v2070_v14  ;;  %v417_v10 = vld [vmem:[#allocation6 + $0x8] sm:$0xff] }
 0x504   :  { %291 = vperm.xlu0 %1715, %v289_v30   ;;  %312 = vmatpush.msra.mxu0 %v2042_v8 }
 0x505   :  { %338 = vmatpush.msra.mxu1 %v2022_v4  ;;  %409 = vmatpush.msra.mxu2 %v2065_v13 }
 0x506   :  { %313 = vmatpush.msra.mxu0 %v2037_v7  ;;  %368 = vrot.lane.b32.xlu1 %v288_v33, %s1920_s25 }
 0x507   :  { %410 = vmatpush.msra.mxu2 %v2060_v12 }
 0x508   :  { %314 = vmatpush.msra.mxu0 %v2032_v6 }
 0x509   :  { %411 = vmatpush.msra.mxu2 %v2055_v11  ;;  %1600 = vmatmul.msk.f32.vlgmr.msra.gmra.mxu0 %vm79_vm2, %v287_v32  ;;  %v440_v32 = vld [vmem:[#allocation12] sm:$0xff] }
 0x576   :  { %v292_v34 = vpop.permute.xlu0 %291 }
 0x577   :  { %vm293_vm15 = vcmp.eq.s32.totalorder %v292_v34, %v2017_v3 }
 0x578   :  { %v1599_v36 = vsel %vm293_vm15, 1.0, %v1921_v35  ;;  %v369_v58 = vpop.permute.xlu1 %368 }
 0x579   :  { %1601 = vmatmul.msk.f32.vlgmr.msra.gmra.mxu1 %vm138_vm3, %v1599_v36 }
 0x586   :  { %v316_v37 = vpop.f32.mrf.mxu0 }
 0x5f6   :  { %v340_v38 = vpop.f32.mrf.mxu1 }
 0x5f7   :  { %v341_v39 = vadd.f32 %v340_v38, %v316_v37 }
 0x5f9   :  { %v346_v40 = vadd.f32 %v341_v39, %v2093_v25 }
 0x5fb   :  { %1716 = vtanh.f32 %v346_v40  ;;  %v1602_v42 = vmul.f32 -1.442695, %v346_v40 }
 0x5fd   :  { %1718 = vpow2.f32 %v1602_v42 }
 0x601   :  { %v1717_v41 = vpop.eup %1716 }
 0x602   :  { %373 = vrot.lane.b32.xlu0 %v1717_v41, %s1920_s25 }
 0x603   :  { %v1719_v43 = vpop.eup %1718 }
 0x604   :  { %v350_v44 = vadd.f32 1.0, %v1719_v43 }
 0x606   :  { %1720 = vrcp.f32 %v350_v44  ;;  %v362_v50 = vand.u32 2147483648, %v350_v44  ;;  %vm356_vm5 = vweird.f32 %v350_v44  ;;  %v360_v51 = vand.u32 2147483647, %v350_v44 }
 0x608   :  { %v363_v54 = vor.u32 1.1754944e-38, %v362_v50  ;;  %vm361_vm7 = vcmp.eq.f32.partialorder %v360_v51, 8.507059e+37 }
 0x60c   :  { %v1721_v45 = vpop.eup %1720 }
 0x60d   :  { %v352_v46 = vmul.f32 %v1721_v45, %v350_v44  ;;  %vm357_vm4 = vweird.f32 %v1721_v45 }
 0x60e   :  { %vm358_vm6 = vmor %vm356_vm5, %vm357_vm4 }
 0x60f   :  { %v353_v47 = vsub.f32 1.0, %v352_v46 }
 0x611   :  { %v354_v48 = vmul.f32 %v1721_v45, %v353_v47 }
 0x613   :  { %v355_v49 = vadd.f32 %v1721_v45, %v354_v48 }
 0x615   :  { %v359_v52 = vsel %vm358_vm6, %v1721_v45, %v355_v49 }
 0x616   :  { %v364_v55 = vsel %vm361_vm7, %v363_v54, %v359_v52 }
 0x617   :  { %v371_v59 = vmul.f32 %v369_v58, %v364_v55 }
 0x674   :  { %v374_v56 = vpop.permute.xlu0 %373 }
 0x675   :  { %v376_v57 = vmul.f32 %v374_v56, %v364_v55 }
 0x677   :  { %378 = vrot.lane.b32.xlu1 %v376_v57, %s1920_s25 }
 0x6e9   :  { %v379_v60 = vpop.permute.xlu1 %378 }
 0x6ea   :  { %v381_v61 = vadd.f32 %v379_v60, %v371_v59 }
 0x6ec   :  { %1722 = vtanh.f32 %v381_v61 }
 0x6f2   :  { %v1723_v62 = vpop.eup %1722 }
 0x6f3   :  { %384 = vrot.lane.b32.xlu2 %v1723_v62, %s1920_s25 }
 0x74d   :  { %v385_v63 = vpop.permute.xlu2 %384 }
 0x74e   :  { %v387_v0 = vmul.f32 %v385_v63, %v364_v55 }
 0x750   :  { %392 = vrot.lane.b32.xlu2 %v387_v0, %s1922_s26 }
 0x7aa   :  { %v393_v1 = vpop.permute.xlu2 %392 }
 0x7ab   :  { %444 = vst.msk [vmem:[#allocation2] sm:$0xff] %vm79_vm2, %v393_v1  ;;  %1603 = vmatmul.msk.f32.vlgmr.msra.gmra.mxu2 %vm79_vm2, %v393_v1 }
 0x82e   :  { %v413_v2 = vpop.f32.mrf.mxu2 }
 0x82f   :  { %v414_v15 = vadd.f32 %v413_v2, %v2102_v53 }
 0x831   :  { %v418_v16 = vadd.f32 %v417_v10, %v414_v15 }
 0x833   :  { %v419_v17 = vsel %vm138_vm3, %v418_v16, -inf }
 0x834   :  { %420 = vmax.xlane.f32.xlu0 %v419_v17 }
 0x8a7   :  { %v421_v18 = vpop.xlane.xlu0 %420 }
 0x8a8   :  { %vm422_vm8 = vcmp.eq.f32.partialorder %v418_v16, %v421_v18 }
 0x8a9   :  { %v423_v19 = vsel %vm422_vm8, %v2017_v3, 16 }
 0x8aa   :  { %v424_v20 = vsel %vm138_vm3, %v423_v19, 2147483647 }
 0x8ab   :  { %v426_v21 = vshra.s32 %v424_v20, 16  ;;  %v425_v23 = vand.u32 65535, %v424_v20 }
 0x8ad   :  { %v428_v22 = vcvt.s32.f32 %v426_v21  ;;  %v427_v26 = vcvt.s32.f32 %v425_v23 }
 0x8af   :  { %429 = vmin.xlane.f32.xlu1 %v428_v22 }
 0x922   :  { %v430_v24 = vpop.xlane.xlu1 %429 }
 0x923   :  { %vm431_vm9 = vcmp.eq.f32.partialorder %v428_v22, %v430_v24  ;;  %v436_v28 = vcvt.f32.s32 %v430_v24 }
 0x924   :  { %v432_v27 = vsel %vm431_vm9, %v427_v26, inf }
 0x925   :  { %433 = vmin.xlane.f32.xlu2 %v432_v27  ;;  %v437_v30 = vshll.u32 %v436_v28, 16 }
 0x93d   :  { %446 = vrot.lane.b32.xlu2 %v381_v61, %s1923_s27 }
 0x998   :  { %v434_v29 = vpop.xlane.xlu2 %433 }
 0x999   :  { %v435_v31 = vcvt.f32.s32 %v434_v29 }
 0x99b   :  { %v438_v33 = vadd.s32 %v437_v30, %v435_v31 }
 0x99d   :  { %v441_v34 = vsel %vm439_vm10, %v438_v33, %v440_v32  ;;  %450 = vst.msk [vmem:[#allocation4] sm:$0xff] %vm83_vm1, %v438_v33  ;;  %v451_v35 = vrot.slane %v438_v33, 4 }
 0x99e   :  { %442 = vst.msk [vmem:[#allocation12] sm:$0xff] %vm76_vm0, %v441_v34 }
 0x99f   :  { %vm452_vm11 = vcmp.gt.s32.totalorder %v438_v33, %v451_v35 }
 0x9a0   :  { %v447_v36 = vpop.permute.xlu2 %446  ;;  %v453_v37 = vsel %vm452_vm11, %v438_v33, %v451_v35 }
 0x9a1   :  { %449 = vst.msk [vmem:[#allocation3] sm:$0xff] %vm79_vm2, %v447_v36  ;;  %v454_v38 = vrot.slane %v453_v37, 2 }
 0x9a3   :  { %vm455_vm12 = vcmp.gt.s32.totalorder %v453_v37, %v454_v38 }
 0x9a4   :  { %v456_v39 = vsel %vm455_vm12, %v453_v37, %v454_v38 }
 0x9a5   :  { %v457_v40 = vrot.slane %v456_v39, 1 }
 0x9a7   :  { %vm458_vm13 = vcmp.gt.s32.totalorder %v456_v39, %v457_v40 }
 0x9a8   :  { %v459_v41 = vsel %vm458_vm13, %v456_v39, %v457_v40 }
 0x9a9   :  { %1642 = vpush %v459_v41 }
 0x9da   :  { %s1643_s28 = spop %1642 }
 0x9db   :  { %p461_p2 = scmp.gt.s32.totalorder %s1643_s28, 0 }
 0x9dd   :  { %s462_s29 = scalar_select %p461_p2, 1, 0 }
 0x9df   :  { %463 = sst [smem:[#allocation5]] %s462_s29 }
 0x9e0 PF:  { %s464_s30 = sld [smem:[#allocation5]] }
 0x9e6   :  { %p1604_p3 = scmp.ne.s32.totalorder %s464_s30, 1 }
 0x9e7   :  { %s1925_s10 = smov (!%p1604_p3), 32   ;;  %s1927_s11 = smov (!%p1604_p3), 64  }
 0x9e8   :  { %468 = sbr.rel (%p1604_p3) target bundleno = 3787 (0xecb), region = 57  ;;  %s1928_s12 = smov (!%p1604_p3), 96  }
 0x9ed   :  { %v471_v42 = vld [vmem:[#allocation4] sm:$0xff]  ;;  %493 = vmatpush.msra.mxu0 %v2047_v9  ;;  %519 = vmatpush.msra.mxu1 %v2027_v5  ;;  %v1924_v43 = vmov 0   ;;  %v469_v44 = vld [vmem:[#allocation2] sm:$0xff]  ;;  %v470_v45 = vld [vmem:[#allocation3] sm:$0xff]  ;;  %v1926_v47 = vmov 0.0   ;;  %vm621_vm9 = vcmp.eq.s32.totalorder %v2017_v3, 2 }
 0x9ee   :  { %1724 = vset.pattern.permute.xlu0 %v1924_v43  ;;  %590 = vmatpush.msra.mxu2 %v2070_v14  ;;  %v599_v27 = vld [vmem:[#allocation6 + $0x10] sm:$0xff] }
 0x9ef   :  { %473 = vperm.xlu0 %1724, %v471_v42   ;;  %494 = vmatpush.msra.mxu0 %v2042_v8 }
 0x9f0   :  { %520 = vmatpush.msra.mxu1 %v2022_v4  ;;  %591 = vmatpush.msra.mxu2 %v2065_v13 }
 0x9f1   :  { %495 = vmatpush.msra.mxu0 %v2037_v7  ;;  %550 = vrot.lane.b32.xlu1 %v470_v45, %s1925_s10 }
 0x9f2   :  { %592 = vmatpush.msra.mxu2 %v2060_v12 }
 0x9f3   :  { %496 = vmatpush.msra.mxu0 %v2032_v6 }
 0x9f4   :  { %593 = vmatpush.msra.mxu2 %v2055_v11  ;;  %1606 = vmatmul.msk.f32.vlgmr.msra.gmra.mxu0 %vm79_vm2, %v469_v44  ;;  %v622_v44 = vld [vmem:[#allocation12] sm:$0xff] }
 0xa61   :  { %v474_v46 = vpop.permute.xlu0 %473 }
 0xa62   :  { %vm475_vm14 = vcmp.eq.s32.totalorder %v474_v46, %v2017_v3 }
 0xa63   :  { %v1605_v48 = vsel %vm475_vm14, 1.0, %v1926_v47  ;;  %v551_v17 = vpop.permute.xlu1 %550 }
 0xa64   :  { %1607 = vmatmul.msk.f32.vlgmr.msra.gmra.mxu1 %vm138_vm3, %v1605_v48 }
 0xa71   :  { %v498_v49 = vpop.f32.mrf.mxu0 }
 0xae1   :  { %v522_v50 = vpop.f32.mrf.mxu1 }
 0xae2   :  { %v523_v51 = vadd.f32 %v522_v50, %v498_v49 }
 0xae4   :  { %v528_v52 = vadd.f32 %v523_v51, %v2093_v25 }
 0xae6   :  { %1725 = vtanh.f32 %v528_v52  ;;  %v1608_v55 = vmul.f32 -1.442695, %v528_v52 }
 0xae8   :  { %1727 = vpow2.f32 %v1608_v55 }
 0xaec   :  { %v1726_v54 = vpop.eup %1725 }
 0xaed   :  { %555 = vrot.lane.b32.xlu0 %v1726_v54, %s1925_s10 }
 0xaee   :  { %v1728_v56 = vpop.eup %1727 }
 0xaef   :  { %v532_v57 = vadd.f32 1.0, %v1728_v56 }
 0xaf1   :  { %1729 = vrcp.f32 %v532_v57  ;;  %v544_v63 = vand.u32 2147483648, %v532_v57  ;;  %vm538_vm4 = vweird.f32 %v532_v57  ;;  %v542_v0 = vand.u32 2147483647, %v532_v57 }
 0xaf3   :  { %v545_v2 = vor.u32 1.1754944e-38, %v544_v63  ;;  %vm543_vm6 = vcmp.eq.f32.partialorder %v542_v0, 8.507059e+37 }
 0xaf7   :  { %v1730_v58 = vpop.eup %1729 }
 0xaf8   :  { %v534_v59 = vmul.f32 %v1730_v58, %v532_v57  ;;  %vm539_vm15 = vweird.f32 %v1730_v58 }
 0xaf9   :  { %vm540_vm5 = vmor %vm538_vm4, %vm539_vm15 }
 0xafa   :  { %v535_v60 = vsub.f32 1.0, %v534_v59 }
 0xafc   :  { %v536_v61 = vmul.f32 %v1730_v58, %v535_v60 }
 0xafe   :  { %v537_v62 = vadd.f32 %v1730_v58, %v536_v61 }
 0xb00   :  { %v541_v1 = vsel %vm540_vm5, %v1730_v58, %v537_v62 }
 0xb01   :  { %v546_v10 = vsel %vm543_vm6, %v545_v2, %v541_v1 }
 0xb02   :  { %v553_v18 = vmul.f32 %v551_v17, %v546_v10 }
 0xb5f   :  { %v556_v15 = vpop.permute.xlu0 %555 }
 0xb60   :  { %v558_v16 = vmul.f32 %v556_v15, %v546_v10 }
 0xb62   :  { %560 = vrot.lane.b32.xlu1 %v558_v16, %s1925_s10 }
 0xbd4   :  { %v561_v19 = vpop.permute.xlu1 %560 }
 0xbd5   :  { %v563_v20 = vadd.f32 %v561_v19, %v553_v18 }
 0xbd7   :  { %1731 = vtanh.f32 %v563_v20 }
 0xbdd   :  { %v1732_v21 = vpop.eup %1731 }
 0xbde   :  { %566 = vrot.lane.b32.xlu2 %v1732_v21, %s1925_s10 }
 0xc38   :  { %v567_v22 = vpop.permute.xlu2 %566 }
 0xc39   :  { %v569_v23 = vmul.f32 %v567_v22, %v546_v10 }
 0xc3b   :  { %574 = vrot.lane.b32.xlu2 %v569_v23, %s1927_s11 }
 0xc95   :  { %v575_v24 = vpop.permute.xlu2 %574 }
 0xc96   :  { %626 = vst.msk [vmem:[#allocation2] sm:$0xff] %vm79_vm2, %v575_v24  ;;  %1609 = vmatmul.msk.f32.vlgmr.msra.gmra.mxu2 %vm79_vm2, %v575_v24 }
 0xd19   :  { %v595_v26 = vpop.f32.mrf.mxu2 }
 0xd1a   :  { %v596_v28 = vadd.f32 %v595_v26, %v2102_v53 }
 0xd1c   :  { %v600_v29 = vadd.f32 %v599_v27, %v596_v28 }
 0xd1e   :  { %v601_v30 = vsel %vm138_vm3, %v600_v29, -inf }
 0xd1f   :  { %602 = vmax.xlane.f32.xlu0 %v601_v30 }
 0xd92   :  { %v603_v31 = vpop.xlane.xlu0 %602 }
 0xd93   :  { %vm604_vm7 = vcmp.eq.f32.partialorder %v600_v29, %v603_v31 }
 0xd94   :  { %v605_v32 = vsel %vm604_vm7, %v2017_v3, 16 }
 0xd95   :  { %v606_v33 = vsel %vm138_vm3, %v605_v32, 2147483647 }
 0xd96   :  { %v608_v34 = vshra.s32 %v606_v33, 16  ;;  %v607_v36 = vand.u32 65535, %v606_v33 }
 0xd98   :  { %v610_v35 = vcvt.s32.f32 %v608_v34  ;;  %v609_v38 = vcvt.s32.f32 %v607_v36 }
 0xd9a   :  { %611 = vmin.xlane.f32.xlu1 %v610_v35 }
 0xe0d   :  { %v612_v37 = vpop.xlane.xlu1 %611 }
 0xe0e   :  { %vm613_vm8 = vcmp.eq.f32.partialorder %v610_v35, %v612_v37  ;;  %v618_v40 = vcvt.f32.s32 %v612_v37 }
 0xe0f   :  { %v614_v39 = vsel %vm613_vm8, %v609_v38, inf }
 0xe10   :  { %615 = vmin.xlane.f32.xlu2 %v614_v39  ;;  %v619_v42 = vshll.u32 %v618_v40, 16 }
 0xe28   :  { %628 = vrot.lane.b32.xlu2 %v563_v20, %s1928_s12 }
 0xe83   :  { %v616_v41 = vpop.xlane.xlu2 %615 }
 0xe84   :  { %v617_v43 = vcvt.f32.s32 %v616_v41 }
 0xe86   :  { %v620_v45 = vadd.s32 %v619_v42, %v617_v43 }
 0xe88   :  { %v623_v46 = vsel %vm621_vm9, %v620_v45, %v622_v44  ;;  %632 = vst.msk [vmem:[#allocation4] sm:$0xff] %vm83_vm1, %v620_v45  ;;  %v633_v47 = vrot.slane %v620_v45, 4 }
 0xe89   :  { %624 = vst.msk [vmem:[#allocation12] sm:$0xff] %vm76_vm0, %v623_v46 }
 0xe8a   :  { %vm634_vm10 = vcmp.gt.s32.totalorder %v620_v45, %v633_v47 }
 0xe8b   :  { %v629_v48 = vpop.permute.xlu2 %628  ;;  %v635_v49 = vsel %vm634_vm10, %v620_v45, %v633_v47 }
 0xe8c   :  { %631 = vst.msk [vmem:[#allocation3] sm:$0xff] %vm79_vm2, %v629_v48  ;;  %v636_v50 = vrot.slane %v635_v49, 2 }
 0xe8e   :  { %vm637_vm11 = vcmp.gt.s32.totalorder %v635_v49, %v636_v50 }
 0xe8f   :  { %v638_v51 = vsel %vm637_vm11, %v635_v49, %v636_v50 }
 0xe90   :  { %v639_v52 = vrot.slane %v638_v51, 1 }
 0xe92   :  { %vm640_vm12 = vcmp.gt.s32.totalorder %v638_v51, %v639_v52 }
 0xe93   :  { %v641_v54 = vsel %vm640_vm12, %v638_v51, %v639_v52 }
 0xe94   :  { %1644 = vpush %v641_v54 }
 0xec5   :  { %s1645_s13 = spop %1644 }
 0xec6   :  { %p643_p4 = scmp.gt.s32.totalorder %s1645_s13, 0 }
 0xec8   :  { %s644_s14 = scalar_select %p643_p4, 1, 0 }
 0xeca   :  { %645 = sst [smem:[#allocation5]] %s644_s14 }
 0xecb PF:  { %s646_s0 = sld [smem:[#allocation5]] }
 0xed1   :  { %p1610_p5 = scmp.ne.s32.totalorder %s646_s0, 1 }
 0xed2   :  { %s1930_s15 = smov (!%p1610_p5), 32   ;;  %s1932_s16 = smov (!%p1610_p5), 64  }
 0xed3   :  { %650 = sbr.rel (%p1610_p5) target bundleno = 5046 (0x13b6), region = 61  ;;  %s1933_s17 = smov (!%p1610_p5), 96  }
 0xed8   :  { %v653_v55 = vld [vmem:[#allocation4] sm:$0xff]  ;;  %675 = vmatpush.msra.mxu0 %v2047_v9  ;;  %701 = vmatpush.msra.mxu1 %v2027_v5  ;;  %v1929_v56 = vmov 0   ;;  %v651_v57 = vld [vmem:[#allocation2] sm:$0xff]  ;;  %v652_v58 = vld [vmem:[#allocation3] sm:$0xff]  ;;  %v1931_v60 = vmov 0.0   ;;  %vm803_vm8 = vcmp.eq.s32.totalorder %v2017_v3, 3 }
 0xed9   :  { %1733 = vset.pattern.permute.xlu0 %v1929_v56  ;;  %772 = vmatpush.msra.mxu2 %v2070_v14  ;;  %v781_v39 = vld [vmem:[#allocation6 + $0x18] sm:$0xff] }
 0xeda   :  { %655 = vperm.xlu0 %1733, %v653_v55   ;;  %676 = vmatpush.msra.mxu0 %v2042_v8 }
 0xedb   :  { %702 = vmatpush.msra.mxu1 %v2022_v4  ;;  %773 = vmatpush.msra.mxu2 %v2065_v13 }
 0xedc   :  { %677 = vmatpush.msra.mxu0 %v2037_v7  ;;  %732 = vrot.lane.b32.xlu1 %v652_v58, %s1930_s15 }
 0xedd   :  { %774 = vmatpush.msra.mxu2 %v2060_v12 }
 0xede   :  { %678 = vmatpush.msra.mxu0 %v2032_v6 }
 0xedf   :  { %775 = vmatpush.msra.mxu2 %v2055_v11  ;;  %1612 = vmatmul.msk.f32.vlgmr.msra.gmra.mxu0 %vm79_vm2, %v651_v57  ;;  %v804_v57 = vld [vmem:[#allocation12] sm:$0xff] }
 0xf4c   :  { %v656_v59 = vpop.permute.xlu0 %655 }
 0xf4d   :  { %vm657_vm13 = vcmp.eq.s32.totalorder %v656_v59, %v2017_v3 }
 0xf4e   :  { %v1611_v61 = vsel %vm657_vm13, 1.0, %v1931_v60  ;;  %v733_v30 = vpop.permute.xlu1 %732 }
 0xf4f   :  { %1613 = vmatmul.msk.f32.vlgmr.msra.gmra.mxu1 %vm138_vm3, %v1611_v61 }
 0xf5c   :  { %v680_v62 = vpop.f32.mrf.mxu0 }
 0xfcc   :  { %v704_v63 = vpop.f32.mrf.mxu1 }
 0xfcd   :  { %v705_v0 = vadd.f32 %v704_v63, %v680_v62 }
 0xfcf   :  { %v710_v1 = vadd.f32 %v705_v0, %v2093_v25 }
 0xfd1   :  { %1734 = vtanh.f32 %v710_v1  ;;  %v1614_v10 = vmul.f32 -1.442695, %v710_v1 }
 0xfd3   :  { %1736 = vpow2.f32 %v1614_v10 }
 0xfd7   :  { %v1735_v2 = vpop.eup %1734 }
 0xfd8   :  { %737 = vrot.lane.b32.xlu0 %v1735_v2, %s1930_s15 }
 0xfd9   :  { %v1737_v15 = vpop.eup %1736 }
 0xfda   :  { %v714_v16 = vadd.f32 1.0, %v1737_v15 }
 0xfdc   :  { %1738 = vrcp.f32 %v714_v16  ;;  %v726_v22 = vand.u32 2147483648, %v714_v16  ;;  %vm720_vm15 = vweird.f32 %v714_v16  ;;  %v724_v23 = vand.u32 2147483647, %v714_v16 }
 0xfde   :  { %v727_v26 = vor.u32 1.1754944e-38, %v726_v22  ;;  %vm725_vm5 = vcmp.eq.f32.partialorder %v724_v23, 8.507059e+37 }
 0xfe2   :  { %v1739_v17 = vpop.eup %1738 }
 0xfe3   :  { %v716_v18 = vmul.f32 %v1739_v17, %v714_v16  ;;  %vm721_vm14 = vweird.f32 %v1739_v17 }
 0xfe4   :  { %vm722_vm4 = vmor %vm720_vm15, %vm721_vm14 }
 0xfe5   :  { %v717_v19 = vsub.f32 1.0, %v716_v18 }
 0xfe7   :  { %v718_v20 = vmul.f32 %v1739_v17, %v717_v19 }
 0xfe9   :  { %v719_v21 = vadd.f32 %v1739_v17, %v718_v20 }
 0xfeb   :  { %v723_v24 = vsel %vm722_vm4, %v1739_v17, %v719_v21 }
 0xfec   :  { %v728_v27 = vsel %vm725_vm5, %v727_v26, %v723_v24 }
 0xfed   :  { %v735_v31 = vmul.f32 %v733_v30, %v728_v27 }
0x104a   :  { %v738_v28 = vpop.permute.xlu0 %737 }
0x104b   :  { %v740_v29 = vmul.f32 %v738_v28, %v728_v27 }
0x104d   :  { %742 = vrot.lane.b32.xlu1 %v740_v29, %s1930_s15 }
0x10bf   :  { %v743_v32 = vpop.permute.xlu1 %742 }
0x10c0   :  { %v745_v33 = vadd.f32 %v743_v32, %v735_v31 }
0x10c2   :  { %1740 = vtanh.f32 %v745_v33 }
0x10c8   :  { %v1741_v34 = vpop.eup %1740 }
0x10c9   :  { %748 = vrot.lane.b32.xlu2 %v1741_v34, %s1930_s15 }
0x1123   :  { %v749_v35 = vpop.permute.xlu2 %748 }
0x1124   :  { %v751_v36 = vmul.f32 %v749_v35, %v728_v27 }
0x1126   :  { %756 = vrot.lane.b32.xlu2 %v751_v36, %s1932_s16 }
0x1180   :  { %v757_v37 = vpop.permute.xlu2 %756 }
0x1181   :  { %808 = vst.msk [vmem:[#allocation2] sm:$0xff] %vm79_vm2, %v757_v37  ;;  %1615 = vmatmul.msk.f32.vlgmr.msra.gmra.mxu2 %vm79_vm2, %v757_v37 }
0x1204   :  { %v777_v38 = vpop.f32.mrf.mxu2 }
0x1205   :  { %v778_v40 = vadd.f32 %v777_v38, %v2102_v53 }
0x1207   :  { %v782_v41 = vadd.f32 %v781_v39, %v778_v40 }
0x1209   :  { %v783_v42 = vsel %vm138_vm3, %v782_v41, -inf }
0x120a   :  { %784 = vmax.xlane.f32.xlu0 %v783_v42 }
0x127d   :  { %v785_v43 = vpop.xlane.xlu0 %784 }
0x127e   :  { %vm786_vm6 = vcmp.eq.f32.partialorder %v782_v41, %v785_v43 }
0x127f   :  { %v787_v44 = vsel %vm786_vm6, %v2017_v3, 16 }
0x1280   :  { %v788_v45 = vsel %vm138_vm3, %v787_v44, 2147483647 }
0x1281   :  { %v790_v46 = vshra.s32 %v788_v45, 16  ;;  %v789_v48 = vand.u32 65535, %v788_v45 }
0x1283   :  { %v792_v47 = vcvt.s32.f32 %v790_v46  ;;  %v791_v50 = vcvt.s32.f32 %v789_v48 }
0x1285   :  { %793 = vmin.xlane.f32.xlu1 %v792_v47 }
0x12f8   :  { %v794_v49 = vpop.xlane.xlu1 %793 }
0x12f9   :  { %vm795_vm7 = vcmp.eq.f32.partialorder %v792_v47, %v794_v49  ;;  %v800_v52 = vcvt.f32.s32 %v794_v49 }
0x12fa   :  { %v796_v51 = vsel %vm795_vm7, %v791_v50, inf }
0x12fb   :  { %797 = vmin.xlane.f32.xlu2 %v796_v51  ;;  %v801_v55 = vshll.u32 %v800_v52, 16 }
0x1313   :  { %810 = vrot.lane.b32.xlu2 %v745_v33, %s1933_s17 }
0x136e   :  { %v798_v54 = vpop.xlane.xlu2 %797 }
0x136f   :  { %v799_v56 = vcvt.f32.s32 %v798_v54 }
0x1371   :  { %v802_v58 = vadd.s32 %v801_v55, %v799_v56 }
0x1373   :  { %v805_v59 = vsel %vm803_vm8, %v802_v58, %v804_v57  ;;  %814 = vst.msk [vmem:[#allocation4] sm:$0xff] %vm83_vm1, %v802_v58  ;;  %v815_v60 = vrot.slane %v802_v58, 4 }
0x1374   :  { %806 = vst.msk [vmem:[#allocation12] sm:$0xff] %vm76_vm0, %v805_v59 }
0x1375   :  { %vm816_vm9 = vcmp.gt.s32.totalorder %v802_v58, %v815_v60 }
0x1376   :  { %v811_v61 = vpop.permute.xlu2 %810  ;;  %v817_v62 = vsel %vm816_vm9, %v802_v58, %v815_v60 }
0x1377   :  { %813 = vst.msk [vmem:[#allocation3] sm:$0xff] %vm79_vm2, %v811_v61  ;;  %v818_v63 = vrot.slane %v817_v62, 2 }
0x1379   :  { %vm819_vm10 = vcmp.gt.s32.totalorder %v817_v62, %v818_v63 }
0x137a   :  { %v820_v0 = vsel %vm819_vm10, %v817_v62, %v818_v63 }
0x137b   :  { %v821_v1 = vrot.slane %v820_v0, 1 }
0x137d   :  { %vm822_vm11 = vcmp.gt.s32.totalorder %v820_v0, %v821_v1 }
0x137e   :  { %v823_v2 = vsel %vm822_vm11, %v820_v0, %v821_v1 }
0x137f   :  { %1646 = vpush %v823_v2 }
0x13b0   :  { %s1647_s18 = spop %1646 }
0x13b1   :  { %p825_p6 = scmp.gt.s32.totalorder %s1647_s18, 0 }
0x13b3   :  { %s826_s19 = scalar_select %p825_p6, 1, 0 }
0x13b5   :  { %827 = sst [smem:[#allocation5]] %s826_s19 }
0x13b6 PF:  { %s828_s20 = sld [smem:[#allocation5]] }
0x13bc   :  { %p1616_p7 = scmp.ne.s32.totalorder %s828_s20, 1 }
0x13bd   :  { %s1935_s21 = smov (!%p1616_p7), 32   ;;  %s1937_s1 = smov (!%p1616_p7), 64  }
0x13be   :  { %832 = sbr.rel (%p1616_p7) target bundleno = 6305 (0x18a1), region = 65  ;;  %s1938_s22 = smov (!%p1616_p7), 96  }
0x13c3   :  { %v835_v10 = vld [vmem:[#allocation4] sm:$0xff]  ;;  %857 = vmatpush.msra.mxu0 %v2047_v9  ;;  %883 = vmatpush.msra.mxu1 %v2027_v5  ;;  %v1934_v15 = vmov 0   ;;  %v833_v16 = vld [vmem:[#allocation2] sm:$0xff]  ;;  %v834_v17 = vld [vmem:[#allocation3] sm:$0xff]  ;;  %v1936_v19 = vmov 0.0   ;;  %vm985_vm7 = vcmp.eq.s32.totalorder %v2017_v3, 4 }
0x13c4   :  { %1742 = vset.pattern.permute.xlu0 %v1934_v15  ;;  %954 = vmatpush.msra.mxu2 %v2070_v14  ;;  %v963_v51 = vld [vmem:[#allocation6 + $0x20] sm:$0xff] }
0x13c5   :  { %837 = vperm.xlu0 %1742, %v835_v10   ;;  %858 = vmatpush.msra.mxu0 %v2042_v8 }
0x13c6   :  { %884 = vmatpush.msra.mxu1 %v2022_v4  ;;  %955 = vmatpush.msra.mxu2 %v2065_v13 }
0x13c7   :  { %859 = vmatpush.msra.mxu0 %v2037_v7  ;;  %914 = vrot.lane.b32.xlu1 %v834_v17, %s1935_s21 }
0x13c8   :  { %956 = vmatpush.msra.mxu2 %v2060_v12 }
0x13c9   :  { %860 = vmatpush.msra.mxu0 %v2032_v6 }
0x13ca   :  { %957 = vmatpush.msra.mxu2 %v2055_v11  ;;  %1618 = vmatmul.msk.f32.vlgmr.msra.gmra.mxu0 %vm79_vm2, %v833_v16  ;;  %v986_v16 = vld [vmem:[#allocation12] sm:$0xff] }
0x1437   :  { %v838_v18 = vpop.permute.xlu0 %837 }
0x1438   :  { %vm839_vm12 = vcmp.eq.s32.totalorder %v838_v18, %v2017_v3 }
0x1439   :  { %v1617_v20 = vsel %vm839_vm12, 1.0, %v1936_v19  ;;  %v915_v42 = vpop.permute.xlu1 %914 }
0x143a   :  { %1619 = vmatmul.msk.f32.vlgmr.msra.gmra.mxu1 %vm138_vm3, %v1617_v20 }
0x1447   :  { %v862_v21 = vpop.f32.mrf.mxu0 }
0x14b7   :  { %v886_v22 = vpop.f32.mrf.mxu1 }
0x14b8   :  { %v887_v23 = vadd.f32 %v886_v22, %v862_v21 }
0x14ba   :  { %v892_v24 = vadd.f32 %v887_v23, %v2093_v25 }
0x14bc   :  { %1743 = vtanh.f32 %v892_v24  ;;  %v1620_v27 = vmul.f32 -1.442695, %v892_v24 }
0x14be   :  { %1745 = vpow2.f32 %v1620_v27 }
0x14c2   :  { %v1744_v26 = vpop.eup %1743 }
0x14c3   :  { %919 = vrot.lane.b32.xlu0 %v1744_v26, %s1935_s21 }
0x14c4   :  { %v1746_v28 = vpop.eup %1745 }
0x14c5   :  { %v896_v29 = vadd.f32 1.0, %v1746_v28 }
0x14c7   :  { %1747 = vrcp.f32 %v896_v29  ;;  %v908_v35 = vand.u32 2147483648, %v896_v29  ;;  %vm902_vm14 = vweird.f32 %v896_v29  ;;  %v906_v36 = vand.u32 2147483647, %v896_v29 }
0x14c9   :  { %v909_v38 = vor.u32 1.1754944e-38, %v908_v35  ;;  %vm907_vm4 = vcmp.eq.f32.partialorder %v906_v36, 8.507059e+37 }
0x14cd   :  { %v1748_v30 = vpop.eup %1747 }
0x14ce   :  { %v898_v31 = vmul.f32 %v1748_v30, %v896_v29  ;;  %vm903_vm13 = vweird.f32 %v1748_v30 }
0x14cf   :  { %vm904_vm15 = vmor %vm902_vm14, %vm903_vm13 }
0x14d0   :  { %v899_v32 = vsub.f32 1.0, %v898_v31 }
0x14d2   :  { %v900_v33 = vmul.f32 %v1748_v30, %v899_v32 }
0x14d4   :  { %v901_v34 = vadd.f32 %v1748_v30, %v900_v33 }
0x14d6   :  { %v905_v37 = vsel %vm904_vm15, %v1748_v30, %v901_v34 }
0x14d7   :  { %v910_v39 = vsel %vm907_vm4, %v909_v38, %v905_v37 }
0x14d8   :  { %v917_v43 = vmul.f32 %v915_v42, %v910_v39 }
0x1535   :  { %v920_v40 = vpop.permute.xlu0 %919 }
0x1536   :  { %v922_v41 = vmul.f32 %v920_v40, %v910_v39 }
0x1538   :  { %924 = vrot.lane.b32.xlu1 %v922_v41, %s1935_s21 }
0x15aa   :  { %v925_v44 = vpop.permute.xlu1 %924 }
0x15ab   :  { %v927_v45 = vadd.f32 %v925_v44, %v917_v43 }
0x15ad   :  { %1749 = vtanh.f32 %v927_v45 }
0x15b3   :  { %v1750_v46 = vpop.eup %1749 }
0x15b4   :  { %930 = vrot.lane.b32.xlu2 %v1750_v46, %s1935_s21 }
0x160e   :  { %v931_v47 = vpop.permute.xlu2 %930 }
0x160f   :  { %v933_v48 = vmul.f32 %v931_v47, %v910_v39 }
0x1611   :  { %938 = vrot.lane.b32.xlu2 %v933_v48, %s1937_s1 }
0x166b   :  { %v939_v49 = vpop.permute.xlu2 %938 }
0x166c   :  { %990 = vst.msk [vmem:[#allocation2] sm:$0xff] %vm79_vm2, %v939_v49  ;;  %1621 = vmatmul.msk.f32.vlgmr.msra.gmra.mxu2 %vm79_vm2, %v939_v49 }
0x16ef   :  { %v959_v50 = vpop.f32.mrf.mxu2 }
0x16f0   :  { %v960_v52 = vadd.f32 %v959_v50, %v2102_v53 }
0x16f2   :  { %v964_v54 = vadd.f32 %v963_v51, %v960_v52 }
0x16f4   :  { %v965_v55 = vsel %vm138_vm3, %v964_v54, -inf }
0x16f5   :  { %966 = vmax.xlane.f32.xlu0 %v965_v55 }
0x1768   :  { %v967_v56 = vpop.xlane.xlu0 %966 }
0x1769   :  { %vm968_vm5 = vcmp.eq.f32.partialorder %v964_v54, %v967_v56 }
0x176a   :  { %v969_v57 = vsel %vm968_vm5, %v2017_v3, 16 }
0x176b   :  { %v970_v58 = vsel %vm138_vm3, %v969_v57, 2147483647 }
0x176c   :  { %v972_v59 = vshra.s32 %v970_v58, 16  ;;  %v971_v61 = vand.u32 65535, %v970_v58 }
0x176e   :  { %v974_v60 = vcvt.s32.f32 %v972_v59  ;;  %v973_v63 = vcvt.s32.f32 %v971_v61 }
0x1770   :  { %975 = vmin.xlane.f32.xlu1 %v974_v60 }
0x17e3   :  { %v976_v62 = vpop.xlane.xlu1 %975 }
0x17e4   :  { %vm977_vm6 = vcmp.eq.f32.partialorder %v974_v60, %v976_v62  ;;  %v982_v1 = vcvt.f32.s32 %v976_v62 }
0x17e5   :  { %v978_v0 = vsel %vm977_vm6, %v973_v63, inf }
0x17e6   :  { %979 = vmin.xlane.f32.xlu2 %v978_v0  ;;  %v983_v10 = vshll.u32 %v982_v1, 16 }
0x17fe   :  { %992 = vrot.lane.b32.xlu2 %v927_v45, %s1938_s22 }
0x1859   :  { %v980_v2 = vpop.xlane.xlu2 %979 }
0x185a   :  { %v981_v15 = vcvt.f32.s32 %v980_v2 }
0x185c   :  { %v984_v17 = vadd.s32 %v983_v10, %v981_v15 }
0x185e   :  { %v987_v18 = vsel %vm985_vm7, %v984_v17, %v986_v16  ;;  %996 = vst.msk [vmem:[#allocation4] sm:$0xff] %vm83_vm1, %v984_v17  ;;  %v997_v19 = vrot.slane %v984_v17, 4 }
0x185f   :  { %988 = vst.msk [vmem:[#allocation12] sm:$0xff] %vm76_vm0, %v987_v18 }
0x1860   :  { %vm998_vm8 = vcmp.gt.s32.totalorder %v984_v17, %v997_v19 }
0x1861   :  { %v993_v20 = vpop.permute.xlu2 %992  ;;  %v999_v21 = vsel %vm998_vm8, %v984_v17, %v997_v19 }
0x1862   :  { %995 = vst.msk [vmem:[#allocation3] sm:$0xff] %vm79_vm2, %v993_v20  ;;  %v1000_v22 = vrot.slane %v999_v21, 2 }
0x1864   :  { %vm1001_vm9 = vcmp.gt.s32.totalorder %v999_v21, %v1000_v22 }
0x1865   :  { %v1002_v23 = vsel %vm1001_vm9, %v999_v21, %v1000_v22 }
0x1866   :  { %v1003_v24 = vrot.slane %v1002_v23, 1 }
0x1868   :  { %vm1004_vm10 = vcmp.gt.s32.totalorder %v1002_v23, %v1003_v24 }
0x1869   :  { %v1005_v26 = vsel %vm1004_vm10, %v1002_v23, %v1003_v24 }
0x186a   :  { %1648 = vpush %v1005_v26 }
0x189b   :  { %s1649_s2 = spop %1648 }
0x189c   :  { %p1007_p8 = scmp.gt.s32.totalorder %s1649_s2, 0 }
0x189e   :  { %s1008_s6 = scalar_select %p1007_p8, 1, 0 }
0x18a0   :  { %1009 = sst [smem:[#allocation5]] %s1008_s6 }
0x18a1 PF:  { %s1010_s3 = sld [smem:[#allocation5]] }
0x18a7   :  { %p1622_p9 = scmp.ne.s32.totalorder %s1010_s3, 1 }
0x18a8   :  { %s1940_s4 = smov (!%p1622_p9), 32   ;;  %s1942_s23 = smov (!%p1622_p9), 64  }
0x18a9   :  { %1014 = sbr.rel (%p1622_p9) target bundleno = 7564 (0x1d8c), region = 69  ;;  %s1943_s24 = smov (!%p1622_p9), 96  }
0x18ae   :  { %v1017_v27 = vld [vmem:[#allocation4] sm:$0xff]  ;;  %1039 = vmatpush.msra.mxu0 %v2047_v9  ;;  %1065 = vmatpush.msra.mxu1 %v2027_v5  ;;  %v1939_v28 = vmov 0   ;;  %v1015_v29 = vld [vmem:[#allocation2] sm:$0xff]  ;;  %v1016_v30 = vld [vmem:[#allocation3] sm:$0xff]  ;;  %v1941_v32 = vmov 0.0   ;;  %vm1167_vm6 = vcmp.eq.s32.totalorder %v2017_v3, 5 }
0x18af   :  { %1751 = vset.pattern.permute.xlu0 %v1939_v28  ;;  %1136 = vmatpush.msra.mxu2 %v2070_v14  ;;  %v1145_v0 = vld [vmem:[#allocation6 + $0x28] sm:$0xff] }
0x18b0   :  { %1019 = vperm.xlu0 %1751, %v1017_v27   ;;  %1040 = vmatpush.msra.mxu0 %v2042_v8 }
0x18b1   :  { %1066 = vmatpush.msra.mxu1 %v2022_v4  ;;  %1137 = vmatpush.msra.mxu2 %v2065_v13 }
0x18b2   :  { %1041 = vmatpush.msra.mxu0 %v2037_v7  ;;  %1096 = vrot.lane.b32.xlu1 %v1016_v30, %s1940_s4 }
0x18b3   :  { %1138 = vmatpush.msra.mxu2 %v2060_v12 }
0x18b4   :  { %1042 = vmatpush.msra.mxu0 %v2032_v6 }
0x18b5   :  { %1139 = vmatpush.msra.mxu2 %v2055_v11  ;;  %1624 = vmatmul.msk.f32.vlgmr.msra.gmra.mxu0 %vm79_vm2, %v1015_v29  ;;  %v1168_v29 = vld [vmem:[#allocation12] sm:$0xff] }
0x1922   :  { %v1020_v31 = vpop.permute.xlu0 %1019 }
0x1923   :  { %vm1021_vm11 = vcmp.eq.s32.totalorder %v1020_v31, %v2017_v3 }
0x1924   :  { %v1623_v33 = vsel %vm1021_vm11, 1.0, %v1941_v32  ;;  %v1097_v55 = vpop.permute.xlu1 %1096 }
0x1925   :  { %1625 = vmatmul.msk.f32.vlgmr.msra.gmra.mxu1 %vm138_vm3, %v1623_v33 }
0x1932   :  { %v1044_v34 = vpop.f32.mrf.mxu0 }
0x19a2   :  { %v1068_v35 = vpop.f32.mrf.mxu1 }
0x19a3   :  { %v1069_v36 = vadd.f32 %v1068_v35, %v1044_v34 }
0x19a5   :  { %v1074_v37 = vadd.f32 %v1069_v36, %v2093_v25 }
0x19a7   :  { %1752 = vtanh.f32 %v1074_v37  ;;  %v1626_v39 = vmul.f32 -1.442695, %v1074_v37 }
0x19a9   :  { %1754 = vpow2.f32 %v1626_v39 }
0x19ad   :  { %v1753_v38 = vpop.eup %1752 }
0x19ae   :  { %1101 = vrot.lane.b32.xlu0 %v1753_v38, %s1940_s4 }
0x19af   :  { %v1755_v40 = vpop.eup %1754 }
0x19b0   :  { %v1078_v41 = vadd.f32 1.0, %v1755_v40 }
0x19b2   :  { %1756 = vrcp.f32 %v1078_v41  ;;  %v1090_v47 = vand.u32 2147483648, %v1078_v41  ;;  %vm1084_vm13 = vweird.f32 %v1078_v41  ;;  %v1088_v48 = vand.u32 2147483647, %v1078_v41 }
0x19b4   :  { %v1091_v50 = vor.u32 1.1754944e-38, %v1090_v47  ;;  %vm1089_vm15 = vcmp.eq.f32.partialorder %v1088_v48, 8.507059e+37 }
0x19b8   :  { %v1757_v42 = vpop.eup %1756 }
0x19b9   :  { %v1080_v43 = vmul.f32 %v1757_v42, %v1078_v41  ;;  %vm1085_vm12 = vweird.f32 %v1757_v42 }
0x19ba   :  { %vm1086_vm14 = vmor %vm1084_vm13, %vm1085_vm12 }
0x19bb   :  { %v1081_v44 = vsub.f32 1.0, %v1080_v43 }
0x19bd   :  { %v1082_v45 = vmul.f32 %v1757_v42, %v1081_v44 }
0x19bf   :  { %v1083_v46 = vadd.f32 %v1757_v42, %v1082_v45 }
0x19c1   :  { %v1087_v49 = vsel %vm1086_vm14, %v1757_v42, %v1083_v46 }
0x19c2   :  { %v1092_v51 = vsel %vm1089_vm15, %v1091_v50, %v1087_v49 }
0x19c3   :  { %v1099_v56 = vmul.f32 %v1097_v55, %v1092_v51 }
0x1a20   :  { %v1102_v52 = vpop.permute.xlu0 %1101 }
0x1a21   :  { %v1104_v54 = vmul.f32 %v1102_v52, %v1092_v51 }
0x1a23   :  { %1106 = vrot.lane.b32.xlu1 %v1104_v54, %s1940_s4 }
0x1a95   :  { %v1107_v57 = vpop.permute.xlu1 %1106 }
0x1a96   :  { %v1109_v58 = vadd.f32 %v1107_v57, %v1099_v56 }
0x1a98   :  { %1758 = vtanh.f32 %v1109_v58 }
0x1a9e   :  { %v1759_v59 = vpop.eup %1758 }
0x1a9f   :  { %1112 = vrot.lane.b32.xlu2 %v1759_v59, %s1940_s4 }
0x1af9   :  { %v1113_v60 = vpop.permute.xlu2 %1112 }
0x1afa   :  { %v1115_v61 = vmul.f32 %v1113_v60, %v1092_v51 }
0x1afc   :  { %1120 = vrot.lane.b32.xlu2 %v1115_v61, %s1942_s23 }
0x1b56   :  { %v1121_v62 = vpop.permute.xlu2 %1120 }
0x1b57   :  { %1172 = vst.msk [vmem:[#allocation2] sm:$0xff] %vm79_vm2, %v1121_v62  ;;  %1627 = vmatmul.msk.f32.vlgmr.msra.gmra.mxu2 %vm79_vm2, %v1121_v62 }
0x1bda   :  { %v1141_v63 = vpop.f32.mrf.mxu2 }
0x1bdb   :  { %v1142_v1 = vadd.f32 %v1141_v63, %v2102_v53 }
0x1bdd   :  { %v1146_v2 = vadd.f32 %v1145_v0, %v1142_v1 }
0x1bdf   :  { %v1147_v10 = vsel %vm138_vm3, %v1146_v2, -inf }
0x1be0   :  { %1148 = vmax.xlane.f32.xlu0 %v1147_v10 }
0x1c53   :  { %v1149_v15 = vpop.xlane.xlu0 %1148 }
0x1c54   :  { %vm1150_vm4 = vcmp.eq.f32.partialorder %v1146_v2, %v1149_v15 }
0x1c55   :  { %v1151_v16 = vsel %vm1150_vm4, %v2017_v3, 16 }
0x1c56   :  { %v1152_v17 = vsel %vm138_vm3, %v1151_v16, 2147483647 }
0x1c57   :  { %v1154_v18 = vshra.s32 %v1152_v17, 16  ;;  %v1153_v20 = vand.u32 65535, %v1152_v17 }
0x1c59   :  { %v1156_v19 = vcvt.s32.f32 %v1154_v18  ;;  %v1155_v22 = vcvt.s32.f32 %v1153_v20 }
0x1c5b   :  { %1157 = vmin.xlane.f32.xlu1 %v1156_v19 }
0x1cce   :  { %v1158_v21 = vpop.xlane.xlu1 %1157 }
0x1ccf   :  { %vm1159_vm5 = vcmp.eq.f32.partialorder %v1156_v19, %v1158_v21  ;;  %v1164_v24 = vcvt.f32.s32 %v1158_v21 }
0x1cd0   :  { %v1160_v23 = vsel %vm1159_vm5, %v1155_v22, inf }
0x1cd1   :  { %1161 = vmin.xlane.f32.xlu2 %v1160_v23  ;;  %v1165_v27 = vshll.u32 %v1164_v24, 16 }
0x1ce9   :  { %1174 = vrot.lane.b32.xlu2 %v1109_v58, %s1943_s24 }
0x1d44   :  { %v1162_v26 = vpop.xlane.xlu2 %1161 }
0x1d45   :  { %v1163_v28 = vcvt.f32.s32 %v1162_v26 }
0x1d47   :  { %v1166_v30 = vadd.s32 %v1165_v27, %v1163_v28 }
0x1d49   :  { %v1169_v31 = vsel %vm1167_vm6, %v1166_v30, %v1168_v29  ;;  %1178 = vst.msk [vmem:[#allocation4] sm:$0xff] %vm83_vm1, %v1166_v30  ;;  %v1179_v32 = vrot.slane %v1166_v30, 4 }
0x1d4a   :  { %1170 = vst.msk [vmem:[#allocation12] sm:$0xff] %vm76_vm0, %v1169_v31 }
0x1d4b   :  { %vm1180_vm7 = vcmp.gt.s32.totalorder %v1166_v30, %v1179_v32 }
0x1d4c   :  { %v1175_v33 = vpop.permute.xlu2 %1174  ;;  %v1181_v34 = vsel %vm1180_vm7, %v1166_v30, %v1179_v32 }
0x1d4d   :  { %1177 = vst.msk [vmem:[#allocation3] sm:$0xff] %vm79_vm2, %v1175_v33  ;;  %v1182_v35 = vrot.slane %v1181_v34, 2 }
0x1d4f   :  { %vm1183_vm8 = vcmp.gt.s32.totalorder %v1181_v34, %v1182_v35 }
0x1d50   :  { %v1184_v36 = vsel %vm1183_vm8, %v1181_v34, %v1182_v35 }
0x1d51   :  { %v1185_v37 = vrot.slane %v1184_v36, 1 }
0x1d53   :  { %vm1186_vm9 = vcmp.gt.s32.totalorder %v1184_v36, %v1185_v37 }
0x1d54   :  { %v1187_v38 = vsel %vm1186_vm9, %v1184_v36, %v1185_v37 }
0x1d55   :  { %1650 = vpush %v1187_v38 }
0x1d86   :  { %s1651_s5 = spop %1650 }
0x1d87   :  { %p1189_p10 = scmp.gt.s32.totalorder %s1651_s5, 0 }
0x1d89   :  { %s1190_s7 = scalar_select %p1189_p10, 1, 0 }
0x1d8b   :  { %1191 = sst [smem:[#allocation5]] %s1190_s7 }
0x1d8c PF:  { %s1192_s25 = sld [smem:[#allocation5]] }
0x1d92   :  { %p1628_p11 = scmp.ne.s32.totalorder %s1192_s25, 1 }
0x1d93   :  { %s1945_s26 = smov (!%p1628_p11), 32   ;;  %s1947_s27 = smov (!%p1628_p11), 64  }
0x1d94   :  { %1196 = sbr.rel (%p1628_p11) target bundleno = 8823 (0x2277), region = 73  ;;  %s1948_s28 = smov (!%p1628_p11), 96  }
0x1d99   :  { %v1199_v39 = vld [vmem:[#allocation4] sm:$0xff]  ;;  %1221 = vmatpush.msra.mxu0 %v2047_v9  ;;  %1247 = vmatpush.msra.mxu1 %v2027_v5  ;;  %v1944_v40 = vmov 0   ;;  %v1197_v41 = vld [vmem:[#allocation2] sm:$0xff]  ;;  %v1198_v42 = vld [vmem:[#allocation3] sm:$0xff]  ;;  %v1946_v44 = vmov 0.0   ;;  %vm1349_vm5 = vcmp.eq.s32.totalorder %v2017_v3, 6 }
0x1d9a   :  { %1760 = vset.pattern.permute.xlu0 %v1944_v40  ;;  %1318 = vmatpush.msra.mxu2 %v2070_v14  ;;  %v1327_v23 = vld [vmem:[#allocation6 + $0x30] sm:$0xff] }
0x1d9b   :  { %1201 = vperm.xlu0 %1760, %v1199_v39   ;;  %1222 = vmatpush.msra.mxu0 %v2042_v8 }
0x1d9c   :  { %1248 = vmatpush.msra.mxu1 %v2022_v4  ;;  %1319 = vmatpush.msra.mxu2 %v2065_v13 }
0x1d9d   :  { %1223 = vmatpush.msra.mxu0 %v2037_v7  ;;  %1278 = vrot.lane.b32.xlu1 %v1198_v42, %s1945_s26 }
0x1d9e   :  { %1320 = vmatpush.msra.mxu2 %v2060_v12 }
0x1d9f   :  { %1224 = vmatpush.msra.mxu0 %v2032_v6 }
0x1da0   :  { %1321 = vmatpush.msra.mxu2 %v2055_v11  ;;  %1630 = vmatmul.msk.f32.vlgmr.msra.gmra.mxu0 %vm79_vm2, %v1197_v41  ;;  %v1350_v41 = vld [vmem:[#allocation12] sm:$0xff] }
0x1e0d   :  { %v1202_v43 = vpop.permute.xlu0 %1201 }
0x1e0e   :  { %vm1203_vm10 = vcmp.eq.s32.totalorder %v1202_v43, %v2017_v3 }
0x1e0f   :  { %v1629_v45 = vsel %vm1203_vm10, 1.0, %v1946_v44  ;;  %v1279_v10 = vpop.permute.xlu1 %1278 }
0x1e10   :  { %1631 = vmatmul.msk.f32.vlgmr.msra.gmra.mxu1 %vm138_vm3, %v1629_v45 }
0x1e1d   :  { %v1226_v46 = vpop.f32.mrf.mxu0 }
0x1e8d   :  { %v1250_v47 = vpop.f32.mrf.mxu1 }
0x1e8e   :  { %v1251_v48 = vadd.f32 %v1250_v47, %v1226_v46 }
0x1e90   :  { %v1256_v49 = vadd.f32 %v1251_v48, %v2093_v25 }
0x1e92   :  { %1761 = vtanh.f32 %v1256_v49  ;;  %v1632_v51 = vmul.f32 -1.442695, %v1256_v49 }
0x1e94   :  { %1763 = vpow2.f32 %v1632_v51 }
0x1e98   :  { %v1762_v50 = vpop.eup %1761 }
0x1e99   :  { %1283 = vrot.lane.b32.xlu0 %v1762_v50, %s1945_s26 }
0x1e9a   :  { %v1764_v52 = vpop.eup %1763 }
0x1e9b   :  { %v1260_v54 = vadd.f32 1.0, %v1764_v52 }
0x1e9d   :  { %1765 = vrcp.f32 %v1260_v54  ;;  %v1272_v60 = vand.u32 2147483648, %v1260_v54  ;;  %vm1266_vm12 = vweird.f32 %v1260_v54  ;;  %v1270_v61 = vand.u32 2147483647, %v1260_v54 }
0x1e9f   :  { %v1273_v63 = vor.u32 1.1754944e-38, %v1272_v60  ;;  %vm1271_vm14 = vcmp.eq.f32.partialorder %v1270_v61, 8.507059e+37 }
0x1ea3   :  { %v1766_v55 = vpop.eup %1765 }
0x1ea4   :  { %v1262_v56 = vmul.f32 %v1766_v55, %v1260_v54  ;;  %vm1267_vm11 = vweird.f32 %v1766_v55 }
0x1ea5   :  { %vm1268_vm13 = vmor %vm1266_vm12, %vm1267_vm11 }
0x1ea6   :  { %v1263_v57 = vsub.f32 1.0, %v1262_v56 }
0x1ea8   :  { %v1264_v58 = vmul.f32 %v1766_v55, %v1263_v57 }
0x1eaa   :  { %v1265_v59 = vadd.f32 %v1766_v55, %v1264_v58 }
0x1eac   :  { %v1269_v62 = vsel %vm1268_vm13, %v1766_v55, %v1265_v59 }
0x1ead   :  { %v1274_v0 = vsel %vm1271_vm14, %v1273_v63, %v1269_v62 }
0x1eae   :  { %v1281_v15 = vmul.f32 %v1279_v10, %v1274_v0 }
0x1f0b   :  { %v1284_v1 = vpop.permute.xlu0 %1283 }
0x1f0c   :  { %v1286_v2 = vmul.f32 %v1284_v1, %v1274_v0 }
0x1f0e   :  { %1288 = vrot.lane.b32.xlu1 %v1286_v2, %s1945_s26 }
0x1f80   :  { %v1289_v16 = vpop.permute.xlu1 %1288 }
0x1f81   :  { %v1291_v17 = vadd.f32 %v1289_v16, %v1281_v15 }
0x1f83   :  { %1767 = vtanh.f32 %v1291_v17 }
0x1f89   :  { %v1768_v18 = vpop.eup %1767 }
0x1f8a   :  { %1294 = vrot.lane.b32.xlu2 %v1768_v18, %s1945_s26 }
0x1fe4   :  { %v1295_v19 = vpop.permute.xlu2 %1294 }
0x1fe5   :  { %v1297_v20 = vmul.f32 %v1295_v19, %v1274_v0 }
0x1fe7   :  { %1302 = vrot.lane.b32.xlu2 %v1297_v20, %s1947_s27 }
0x2041   :  { %v1303_v21 = vpop.permute.xlu2 %1302 }
0x2042   :  { %1354 = vst.msk [vmem:[#allocation2] sm:$0xff] %vm79_vm2, %v1303_v21  ;;  %1633 = vmatmul.msk.f32.vlgmr.msra.gmra.mxu2 %vm79_vm2, %v1303_v21 }
0x20c5   :  { %v1323_v22 = vpop.f32.mrf.mxu2 }
0x20c6   :  { %v1324_v24 = vadd.f32 %v1323_v22, %v2102_v53 }
0x20c8   :  { %v1328_v26 = vadd.f32 %v1327_v23, %v1324_v24 }
0x20ca   :  { %v1329_v27 = vsel %vm138_vm3, %v1328_v26, -inf }
0x20cb   :  { %1330 = vmax.xlane.f32.xlu0 %v1329_v27 }
0x213e   :  { %v1331_v28 = vpop.xlane.xlu0 %1330 }
0x213f   :  { %vm1332_vm15 = vcmp.eq.f32.partialorder %v1328_v26, %v1331_v28 }
0x2140   :  { %v1333_v29 = vsel %vm1332_vm15, %v2017_v3, 16 }
0x2141   :  { %v1334_v30 = vsel %vm138_vm3, %v1333_v29, 2147483647 }
0x2142   :  { %v1336_v31 = vshra.s32 %v1334_v30, 16  ;;  %v1335_v33 = vand.u32 65535, %v1334_v30 }
0x2144   :  { %v1338_v32 = vcvt.s32.f32 %v1336_v31  ;;  %v1337_v35 = vcvt.s32.f32 %v1335_v33 }
0x2146   :  { %1339 = vmin.xlane.f32.xlu1 %v1338_v32 }
0x21b9   :  { %v1340_v34 = vpop.xlane.xlu1 %1339 }
0x21ba   :  { %vm1341_vm4 = vcmp.eq.f32.partialorder %v1338_v32, %v1340_v34  ;;  %v1346_v37 = vcvt.f32.s32 %v1340_v34 }
0x21bb   :  { %v1342_v36 = vsel %vm1341_vm4, %v1337_v35, inf }
0x21bc   :  { %1343 = vmin.xlane.f32.xlu2 %v1342_v36  ;;  %v1347_v39 = vshll.u32 %v1346_v37, 16 }
0x21d4   :  { %1356 = vrot.lane.b32.xlu2 %v1291_v17, %s1948_s28 }
0x222f   :  { %v1344_v38 = vpop.xlane.xlu2 %1343 }
0x2230   :  { %v1345_v40 = vcvt.f32.s32 %v1344_v38 }
0x2232   :  { %v1348_v42 = vadd.s32 %v1347_v39, %v1345_v40 }
0x2234   :  { %v1351_v43 = vsel %vm1349_vm5, %v1348_v42, %v1350_v41  ;;  %1360 = vst.msk [vmem:[#allocation4] sm:$0xff] %vm83_vm1, %v1348_v42  ;;  %v1361_v44 = vrot.slane %v1348_v42, 4 }
0x2235   :  { %1352 = vst.msk [vmem:[#allocation12] sm:$0xff] %vm76_vm0, %v1351_v43 }
0x2236   :  { %vm1362_vm6 = vcmp.gt.s32.totalorder %v1348_v42, %v1361_v44 }
0x2237   :  { %v1357_v45 = vpop.permute.xlu2 %1356  ;;  %v1363_v46 = vsel %vm1362_vm6, %v1348_v42, %v1361_v44 }
0x2238   :  { %1359 = vst.msk [vmem:[#allocation3] sm:$0xff] %vm79_vm2, %v1357_v45  ;;  %v1364_v47 = vrot.slane %v1363_v46, 2 }
0x223a   :  { %vm1365_vm7 = vcmp.gt.s32.totalorder %v1363_v46, %v1364_v47 }
0x223b   :  { %v1366_v48 = vsel %vm1365_vm7, %v1363_v46, %v1364_v47 }
0x223c   :  { %v1367_v49 = vrot.slane %v1366_v48, 1 }
0x223e   :  { %vm1368_vm8 = vcmp.gt.s32.totalorder %v1366_v48, %v1367_v49 }
0x223f   :  { %v1369_v50 = vsel %vm1368_vm8, %v1366_v48, %v1367_v49 }
0x2240   :  { %1652 = vpush %v1369_v50 }
0x2271   :  { %s1653_s29 = spop %1652 }
0x2272   :  { %p1371_p12 = scmp.gt.s32.totalorder %s1653_s29, 0 }
0x2274   :  { %s1372_s30 = scalar_select %p1371_p12, 1, 0 }
0x2276   :  { %1373 = sst [smem:[#allocation5]] %s1372_s30 }
0x2277 PF:  { %s1374_s10 = sld [smem:[#allocation5]] }
0x227d   :  { %p1634_p13 = scmp.ne.s32.totalorder %s1374_s10, 1 }
0x227e   :  { %s1950_s11 = smov (!%p1634_p13), 32   ;;  %s1952_s12 = smov (!%p1634_p13), 64  }
0x227f   :  { %1378 = sbr.rel (%p1634_p13) target bundleno = 10082 (0x2762), region = 77  ;;  %s1953_s13 = smov (!%p1634_p13), 96  }
0x2284   :  { %v1381_v51 = vld [vmem:[#allocation4] sm:$0xff]  ;;  %1403 = vmatpush.msra.mxu0 %v2047_v9  ;;  %1429 = vmatpush.msra.mxu1 %v2027_v5  ;;  %v1949_v52 = vmov 0   ;;  %v1379_v5 = vld [vmem:[#allocation2] sm:$0xff]  ;;  %v1380_v9 = vld [vmem:[#allocation3] sm:$0xff]  ;;  %vm1531_vm4 = vcmp.eq.s32.totalorder %v2017_v3, 7 }
0x2285   :  { %1769 = vset.pattern.permute.xlu0 %v1949_v52  ;;  %1500 = vmatpush.msra.mxu2 %v2070_v14  ;;  %v1509_v24 = vld [vmem:[#allocation6 + $0x38] sm:$0xff]  ;;  %v1532_v41 = vld [vmem:[#allocation12] sm:$0xff] }
0x2286   :  { %1383 = vperm.xlu0 %1769, %v1381_v51   ;;  %1404 = vmatpush.msra.mxu0 %v2042_v8 }
0x2287   :  { %1430 = vmatpush.msra.mxu1 %v2022_v4  ;;  %1501 = vmatpush.msra.mxu2 %v2065_v13  ;;  %v1951_v4 = vmov 0.0  }
0x2288   :  { %1405 = vmatpush.msra.mxu0 %v2037_v7  ;;  %1460 = vrot.lane.b32.xlu1 %v1380_v9, %s1950_s11 }
0x2289   :  { %1502 = vmatpush.msra.mxu2 %v2060_v12 }
0x228a   :  { %1406 = vmatpush.msra.mxu0 %v2032_v6 }
0x228b   :  { %1503 = vmatpush.msra.mxu2 %v2055_v11  ;;  %1636 = vmatmul.msk.f32.vlgmr.msra.gmra.mxu0 %vm79_vm2, %v1379_v5 }
0x22f8   :  { %v1384_v8 = vpop.permute.xlu0 %1383 }
0x22f9   :  { %vm1385_vm9 = vcmp.eq.s32.totalorder %v1384_v8, %v2017_v3 }
0x22fa   :  { %v1635_v13 = vsel %vm1385_vm9, 1.0, %v1951_v4  ;;  %v1461_v15 = vpop.permute.xlu1 %1460 }
0x22fb   :  { %1637 = vmatmul.msk.f32.vlgmr.msra.gmra.mxu1 %vm138_vm3, %v1635_v13 }
0x2308   :  { %v1408_v7 = vpop.f32.mrf.mxu0 }
0x2378   :  { %v1432_v12 = vpop.f32.mrf.mxu1 }
0x2379   :  { %v1433_v14 = vadd.f32 %v1432_v12, %v1408_v7 }
0x237b   :  { %v1438_v6 = vadd.f32 %v1433_v14, %v2093_v25 }
0x237d   :  { %1770 = vtanh.f32 %v1438_v6  ;;  %v1638_v54 = vmul.f32 -1.442695, %v1438_v6 }
0x237f   :  { %1772 = vpow2.f32 %v1638_v54 }
0x2383   :  { %v1771_v11 = vpop.eup %1770 }
0x2384   :  { %1465 = vrot.lane.b32.xlu0 %v1771_v11, %s1950_s11 }
0x2385   :  { %v1773_v55 = vpop.eup %1772 }
0x2386   :  { %v1442_v56 = vadd.f32 1.0, %v1773_v55 }
0x2388   :  { %1774 = vrcp.f32 %v1442_v56  ;;  %v1454_v62 = vand.u32 2147483648, %v1442_v56  ;;  %vm1448_vm11 = vweird.f32 %v1442_v56  ;;  %v1452_v63 = vand.u32 2147483647, %v1442_v56 }
0x238a   :  { %v1455_v0 = vor.u32 1.1754944e-38, %v1454_v62  ;;  %vm1453_vm13 = vcmp.eq.f32.partialorder %v1452_v63, 8.507059e+37 }
0x238e   :  { %v1775_v57 = vpop.eup %1774 }
0x238f   :  { %v1444_v58 = vmul.f32 %v1775_v57, %v1442_v56  ;;  %vm1449_vm10 = vweird.f32 %v1775_v57 }
0x2390   :  { %vm1450_vm12 = vmor %vm1448_vm11, %vm1449_vm10 }
0x2391   :  { %v1445_v59 = vsub.f32 1.0, %v1444_v58 }
0x2393   :  { %v1446_v60 = vmul.f32 %v1775_v57, %v1445_v59 }
0x2395   :  { %v1447_v61 = vadd.f32 %v1775_v57, %v1446_v60 }
0x2397   :  { %v1451_v25 = vsel %vm1450_vm12, %v1775_v57, %v1447_v61 }
0x2398   :  { %v1456_v1 = vsel %vm1453_vm13, %v1455_v0, %v1451_v25 }
0x2399   :  { %v1463_v16 = vmul.f32 %v1461_v15, %v1456_v1 }
0x23f6   :  { %v1466_v2 = vpop.permute.xlu0 %1465 }
0x23f7   :  { %v1468_v10 = vmul.f32 %v1466_v2, %v1456_v1 }
0x23f9   :  { %1470 = vrot.lane.b32.xlu1 %v1468_v10, %s1950_s11 }
0x246b   :  { %v1471_v17 = vpop.permute.xlu1 %1470 }
0x246c   :  { %v1473_v18 = vadd.f32 %v1471_v17, %v1463_v16 }
0x246e   :  { %1776 = vtanh.f32 %v1473_v18 }
0x2474   :  { %v1777_v19 = vpop.eup %1776 }
0x2475   :  { %1476 = vrot.lane.b32.xlu2 %v1777_v19, %s1950_s11 }
0x24cf   :  { %v1477_v20 = vpop.permute.xlu2 %1476 }
0x24d0   :  { %v1479_v21 = vmul.f32 %v1477_v20, %v1456_v1 }
0x24d2   :  { %1484 = vrot.lane.b32.xlu2 %v1479_v21, %s1952_s12 }
0x252c   :  { %v1485_v22 = vpop.permute.xlu2 %1484 }
0x252d   :  { %1536 = vst.msk [vmem:[#allocation2] sm:$0xff] %vm79_vm2, %v1485_v22  ;;  %1639 = vmatmul.msk.f32.vlgmr.msra.gmra.mxu2 %vm79_vm2, %v1485_v22 }
0x25b0   :  { %v1505_v23 = vpop.f32.mrf.mxu2 }
0x25b1   :  { %v1506_v26 = vadd.f32 %v1505_v23, %v2102_v53 }
0x25b3   :  { %v1510_v27 = vadd.f32 %v1509_v24, %v1506_v26 }
0x25b5   :  { %v1511_v28 = vsel %vm138_vm3, %v1510_v27, -inf }
0x25b6   :  { %1512 = vmax.xlane.f32.xlu0 %v1511_v28 }
0x2629   :  { %v1513_v29 = vpop.xlane.xlu0 %1512 }
0x262a   :  { %vm1514_vm14 = vcmp.eq.f32.partialorder %v1510_v27, %v1513_v29 }
0x262b   :  { %v1515_v30 = vsel %vm1514_vm14, %v2017_v3, 16 }
0x262c   :  { %v1516_v31 = vsel %vm138_vm3, %v1515_v30, 2147483647 }
0x262d   :  { %v1518_v32 = vshra.s32 %v1516_v31, 16  ;;  %v1517_v34 = vand.u32 65535, %v1516_v31 }
0x262f   :  { %v1520_v33 = vcvt.s32.f32 %v1518_v32  ;;  %v1519_v36 = vcvt.s32.f32 %v1517_v34 }
0x2631   :  { %1521 = vmin.xlane.f32.xlu1 %v1520_v33 }
0x26a4   :  { %v1522_v35 = vpop.xlane.xlu1 %1521 }
0x26a5   :  { %vm1523_vm15 = vcmp.eq.f32.partialorder %v1520_v33, %v1522_v35  ;;  %v1528_v53 = vcvt.f32.s32 %v1522_v35 }
0x26a6   :  { %v1524_v37 = vsel %vm1523_vm15, %v1519_v36, inf }
0x26a7   :  { %1525 = vmin.xlane.f32.xlu2 %v1524_v37  ;;  %v1529_v39 = vshll.u32 %v1528_v53, 16 }
0x26bf   :  { %1538 = vrot.lane.b32.xlu2 %v1473_v18, %s1953_s13 }
0x271a   :  { %v1526_v38 = vpop.xlane.xlu2 %1525 }
0x271b   :  { %v1527_v40 = vcvt.f32.s32 %v1526_v38 }
0x271d   :  { %v1530_v42 = vadd.s32 %v1529_v39, %v1527_v40 }
0x271f   :  { %v1533_v43 = vsel %vm1531_vm4, %v1530_v42, %v1532_v41  ;;  %1542 = vst.msk [vmem:[#allocation4] sm:$0xff] %vm83_vm1, %v1530_v42  ;;  %v1543_v44 = vrot.slane %v1530_v42, 4 }
0x2720   :  { %1534 = vst.msk [vmem:[#allocation12] sm:$0xff] %vm76_vm0, %v1533_v43 }
0x2721   :  { %vm1544_vm3 = vcmp.gt.s32.totalorder %v1530_v42, %v1543_v44 }
0x2722   :  { %v1539_v45 = vpop.permute.xlu2 %1538  ;;  %v1545_v46 = vsel %vm1544_vm3, %v1530_v42, %v1543_v44 }
0x2723   :  { %1541 = vst.msk [vmem:[#allocation3] sm:$0xff] %vm79_vm2, %v1539_v45  ;;  %v1546_v47 = vrot.slane %v1545_v46, 2 }
0x2725   :  { %vm1547_vm5 = vcmp.gt.s32.totalorder %v1545_v46, %v1546_v47 }
0x2726   :  { %v1548_v48 = vsel %vm1547_vm5, %v1545_v46, %v1546_v47 }
0x2727   :  { %v1549_v49 = vrot.slane %v1548_v48, 1 }
0x2729   :  { %vm1550_vm6 = vcmp.gt.s32.totalorder %v1548_v48, %v1549_v49 }
0x272a   :  { %v1551_v50 = vsel %vm1550_vm6, %v1548_v48, %v1549_v49 }
0x272b   :  { %1654 = vpush %v1551_v50 }
0x275c   :  { %s1655_s14 = spop %1654 }
0x275d   :  { %p1553_p0 = scmp.gt.s32.totalorder %s1655_s14, 0 }
0x275f   :  { %s1554_s0 = scalar_select %p1553_p0, 1, 0 }
0x2761   :  { %1555 = sst [smem:[#allocation5]] %s1554_s0 }
0x2762 PF:  { %v1556_v3 = vld [vmem:[#allocation2] sm:$0xff]  ;;  %s1565_s17 = sshll.u32 %s2323_s8, 4  ;;  %s1954_s18 = smov [#allocation12]   ;;  %s1566_s17 = int_to_ptr.hbm [resolvable:$true] %s1565_s17 }
0x2763   :  { %1557 = vst.msk [vmem:[#allocation13] sm:$0xff] %vm79_vm2, %v1556_v3  ;;  %s1563_s19 = sshll.u32 %s1954_s18, 4  ;;  %s1955_s20 = smov [#allocation13]   ;;  %s1564_s19 = int_to_ptr.vmem [resolvable:$true] %s1563_s19 }
0x2764   :  { %1568 = dma.vmem_to_hbm [thread:$0]  %s1564_s19, 128, %s1566_s17, [#allocation8]  }
0x2765   :  { %s1574_s21 = sshll.u32 %s1955_s20, 4  ;;  %s1576_s2 = sshll.u32 %s2324_s9, 4  ;;  %s1575_s21 = int_to_ptr.vmem [resolvable:$true] %s1574_s21  ;;  %s1577_s2 = int_to_ptr.hbm [resolvable:$true] %s1576_s2 }
0x2766   :  { %1579 = dma.vmem_to_hbm [thread:$0]  %s1575_s21, 128, %s1577_s2, [#allocation14]  }
0x2767   :  { %1903 = dma.done.wait [#allocation8], 128  }
0x2768   :  { %1904 = vsyncadd [#allocation8], 4294967168 }
0x2769   :  { %1905 = dma.done.wait [#allocation14], 128  }
0x276a   :  { %1906 = vsyncadd [#allocation14], 4294967168 }
0x276b   :  { %1588 = vsyncpa [#allocation7], 1 }
0x276c   :  { %1589 = vsyncpa [#allocation10], 1 }
0x276d   :  { %1590 = vsyncpa [#allocation8], 1 }
0x276e   :  { %1591 = vsyncpa [#allocation14], 1 }

</bundles_post_ra>
